<compile_context>
chip_gen: v5e
topology: v5e:2x2
jax: 0.10.0
libtpu: 0.0.40
codegen_flags: <defaults>
</compile_context>

<pallas_src>
import functools

import jax
import jax.numpy as jnp
from jax.experimental import pallas as pl
from jax.experimental.pallas import tpu as pltpu

EPS = 1e-5
LANE = 128                             # pad Cout to a multiple of this (dense vst)
ROW_ALIGN = 16                         # sublane alignment safe for f32 and bf16 tiles
VMEM_LIMIT_BYTES = 48 * 1024 * 1024    # fits v7x's 64 MiB VMEM with headroom


# ----------------------------------------------------------------------------
# small helpers
# ----------------------------------------------------------------------------
def _round_up(a, b):
    return (a + b - 1) // b * b


def _pad_axis(x, axis, new_size):
    if x.shape[axis] == new_size:
        return x
    pads = [(0, 0)] * x.ndim
    pads[axis] = (0, new_size - x.shape[axis])
    return jnp.pad(x, pads)


def _choose_tile_hw(hw, k, cout_p, *, cap=2048, budget_bytes=12 * 1024 * 1024):
    """Rows (of the im2col matrix) per grid step.

    Budget covers the double-buffered pipelines of both kernels
      conv pass : bf16 cols (2k) + bf16 conv-out (2*Cout_p)
      BN pass   : bf16 conv-out + bf16 residual-raw + f32 output
    plus the resident (double-buffered) weight tile; sized for the smallest
    part (v7x, 64 MiB VMEM).  On 128 MiB v5e/v6e `cap` can be raised to ~4096.
    """
    fixed = 4 * k * cout_p                                   # bf16 weights, 2 bufs
    per_row = max(2 * (2 * k + 2 * cout_p),                  # conv/stats pass
                  2 * (2 * cout_p + 2 * cout_p + 4 * cout_p))  # fused BN pass
    tile = max(budget_bytes - fixed, per_row) // per_row
    tile = min(tile, cap, _round_up(hw, ROW_ALIGN))
    tile = max(ROW_ALIGN, (tile // ROW_ALIGN) * ROW_ALIGN)
    return tile


# ----------------------------------------------------------------------------
# Pallas kernels
# ----------------------------------------------------------------------------
def conv_stats_kernel(cols_ref, w_ref, out_ref, stats_ref):
    # cols_ref : (1, TILE, K)       bf16 im2col patches
    # w_ref    : (K, Cout_p)        bf16 weights (resident across the grid)
    # out_ref  : (1, TILE, Cout_p)  bf16 raw conv output (stats stay f32)
    # stats_ref: (1, 1, 2, Cout_p)  f32 per-tile [sum, sum-of-squares]
    acc = jnp.dot(cols_ref[0], w_ref[...], preferred_element_type=jnp.float32)
    out_ref[...] = acc[None].astype(out_ref.dtype)
    s1 = jnp.sum(acc, axis=0, keepdims=True)
    s2 = jnp.sum(acc * acc, axis=0, keepdims=True)
    stats_ref[...] = jnp.concatenate([s1, s2], axis=0)[None, None]


def bn_apply_kernel(acc_ref, scale_ref, bias_ref, *rest,
                    has_gate, residual_mode, apply_relu):
    # y = conv_raw * scale + bias   (folded BatchNorm)
    # optionally: * gate (ARM), + residual (plain or folded-BN), ReLU.
    refs = list(rest)
    o_ref = refs.pop()                       # last ref is the output
    y = acc_ref[...].astype(jnp.float32) * scale_ref[...] + bias_ref[...]
    i = 0
    if has_gate:
        y = y * refs[i][...]                 # (1, 1, Cout_p) broadcast
        i += 1
    if residual_mode == "plain":
        y = y + refs[i][...].astype(jnp.float32)
        i += 1
    elif residual_mode == "bn":              # fused downsample BatchNorm
        r = (refs[i][...].astype(jnp.float32) * refs[i + 1][...]
             + refs[i + 2][...])
        y = y + r
        i += 3
    if apply_relu:
        y = jnp.maximum(y, 0.0)
    o_ref[...] = y.astype(o_ref.dtype)


def arm_gate_kernel(pooled_ref, w1_ref, w2_ref, gate_ref):
    # sigmoid(conv2_1x1(relu(conv1_1x1(global_avg_pool(x))))) on (N, C) rows.
    h = jnp.dot(pooled_ref[...], w1_ref[...], preferred_element_type=jnp.float32)
    h = jnp.maximum(h, 0.0)
    logits = jnp.dot(h, w2_ref[...], preferred_element_type=jnp.float32)
    gate_ref[...] = 1.0 / (1.0 + jnp.exp(-logits))


# ----------------------------------------------------------------------------
# pallas_call wrappers
# ----------------------------------------------------------------------------
def conv_stats(cols, w_mat, tile_hw):
    n, hw_pad, k = cols.shape
    cout_p = w_mat.shape[1]
    n_tiles = hw_pad // tile_hw
    flops = 2 * n * hw_pad * k * cout_p
    bytes_accessed = (cols.size * cols.dtype.itemsize
                      + w_mat.size * w_mat.dtype.itemsize
                      + n * hw_pad * cout_p * 2)
    return pl.pallas_call(
        conv_stats_kernel,
        out_shape=(jax.ShapeDtypeStruct((n, hw_pad, cout_p), jnp.bfloat16),
                   jax.ShapeDtypeStruct((n, n_tiles, 2, cout_p), jnp.float32)),
        grid=(n, n_tiles),
        in_specs=[
            pl.BlockSpec((1, tile_hw, k), lambda i, j: (i, j, 0)),
            pl.BlockSpec((k, cout_p), lambda i, j: (0, 0)),
        ],
        out_specs=(
            pl.BlockSpec((1, tile_hw, cout_p), lambda i, j: (i, j, 0)),
            pl.BlockSpec((1, 1, 2, cout_p), lambda i, j: (i, j, 0, 0)),
        ),
        compiler_params=pltpu.CompilerParams(
            dimension_semantics=("parallel", "parallel"),
            vmem_limit_bytes=VMEM_LIMIT_BYTES),
        cost_estimate=pl.CostEstimate(flops=int(flops), transcendentals=0,
                                      bytes_accessed=int(bytes_accessed)),
    )(cols, w_mat)


def bn_apply(conv_raw, scale, bias, tile_hw, *, gate=None, residual=None,
             res_scale=None, res_bias=None, apply_relu, out_dtype):
    n, hw_pad, cout_p = conv_raw.shape
    n_tiles = hw_pad // tile_hw
    tile_spec = pl.BlockSpec((1, tile_hw, cout_p), lambda i, j: (i, j, 0))
    chan_spec = pl.BlockSpec((1, 1, cout_p), lambda i, j: (0, 0, 0))
    gate_spec = pl.BlockSpec((1, 1, cout_p), lambda i, j: (i, 0, 0))

    inputs = [conv_raw, scale.reshape(1, 1, cout_p), bias.reshape(1, 1, cout_p)]
    in_specs = [tile_spec, chan_spec, chan_spec]
    if gate is not None:
        inputs.append(gate.reshape(n, 1, cout_p))
        in_specs.append(gate_spec)
    residual_mode = "none"
    if residual is not None:
        inputs.append(residual)
        in_specs.append(tile_spec)
        if res_scale is not None:           # fused downsample BN
            residual_mode = "bn"
            inputs += [res_scale.reshape(1, 1, cout_p),
                       res_bias.reshape(1, 1, cout_p)]
            in_specs += [chan_spec, chan_spec]
        else:
            residual_mode = "plain"

    kernel = functools.partial(bn_apply_kernel,
                               has_gate=gate is not None,
                               residual_mode=residual_mode,
                               apply_relu=apply_relu)
    return pl.pallas_call(
        kernel,
        out_shape=jax.ShapeDtypeStruct((n, hw_pad, cout_p), out_dtype),
        grid=(n, n_tiles),
        in_specs=in_specs,
        out_specs=tile_spec,
        compiler_params=pltpu.CompilerParams(
            dimension_semantics=("parallel", "parallel"),
            vmem_limit_bytes=VMEM_LIMIT_BYTES),
    )(*inputs)


def arm_gate(pooled, w1_mat, w2_mat):
    # Tiny (N, C) squeeze MLP -> whole arrays in VMEM, single invocation.
    n, cout_p = pooled.shape
    vmem = pl.BlockSpec(memory_space=pltpu.MemorySpace.VMEM)
    return pl.pallas_call(
        arm_gate_kernel,
        out_shape=jax.ShapeDtypeStruct((n, cout_p), jnp.float32),
        in_specs=[vmem, vmem, vmem],
        out_specs=vmem,
    )(pooled, w1_mat, w2_mat)


# ----------------------------------------------------------------------------
# JAX glue: im2col, weight reshaping, BN folding, parameter init
# ----------------------------------------------------------------------------
def im2col(x_nhwc, kh, kw, stride, padding):
    """(N, H, W, C) -> ((N, Ho*Wo, kh*kw*C), (Ho, Wo)); patch order (kh, kw, C)."""
    n, h, w, c = x_nhwc.shape
    xp = jnp.pad(x_nhwc,
                 ((0, 0), (padding, padding), (padding, padding), (0, 0)))
    ho = (h + 2 * padding - kh) // stride + 1
    wo = (w + 2 * padding - kw) // stride + 1
    patches = []
    for i in range(kh):
        for j in range(kw):
            patches.append(xp[:, i:i + stride * ho:stride,
                               j:j + stride * wo:stride, :])
    cols = jnp.concatenate(patches, axis=-1)        # (N, Ho, Wo, kh*kw*C)
    return cols.reshape(n, ho * wo, kh * kw * c), (ho, wo)


def torch_conv_weight_to_matmul(wt):
    """(Cout, Cin, KH, KW) -> (KH*KW*Cin, Cout), matching im2col column order."""
    c_out, c_in, kh, kw = wt.shape
    return jnp.transpose(wt, (2, 3, 1, 0)).reshape(kh * kw * c_in, c_out)


def bn_fold(stats, count, gamma_p, beta_p):
    """Per-tile [sum, sumsq] -> folded per-channel (scale, bias) over FULL batch."""
    s = stats.sum(axis=(0, 1))                       # (2, Cout_p)
    mean = s[0] / count
    var = jnp.maximum(s[1] / count - mean * mean, 0.0)   # biased var (PyTorch train)
    scale = gamma_p * jax.lax.rsqrt(var + EPS)
    bias = beta_p - mean * scale
    return scale, bias


def init_basic_block_arm_params(key, in_chan, out_chan, stride):
    assert out_chan >= 16, "ARM mid channels = out_chan // 16 must be >= 1"
    mid = out_chan // 16
    ks = jax.random.split(key, 10)

    def kaiming(k, shape, fan_in):
        return jax.random.normal(k, shape, jnp.float32) / jnp.sqrt(float(fan_in))

    params = {
        "w1": kaiming(ks[0], (out_chan, in_chan, 3, 3), 9 * in_chan),
        "g1": 1.0 + 0.1 * jax.random.normal(ks[1], (out_chan,), jnp.float32),
        "b1": 0.1 * jax.random.normal(ks[2], (out_chan,), jnp.float32),
        "w2": kaiming(ks[3], (out_chan, out_chan, 3, 3), 9 * out_chan),
        "g2": 1.0 + 0.1 * jax.random.normal(ks[4], (out_chan,), jnp.float32),
        "b2": 0.1 * jax.random.normal(ks[5], (out_chan,), jnp.float32),
        # AttentionRefinementModule 1x1 convs (kaiming a=1 ~ std 1/sqrt(fan_in))
        "wa1": kaiming(ks[6], (mid, out_chan, 1, 1), out_chan),
        "wa2": kaiming(ks[7], (out_chan, mid, 1, 1), mid),
    }
    if in_chan != out_chan or stride != 1:
        params["wd"] = kaiming(ks[8], (out_chan, in_chan, 1, 1), in_chan)
        params["gd"] = 1.0 + 0.05 * jax.random.normal(ks[9], (out_chan,), jnp.float32)
        params["bd"] = jnp.zeros((out_chan,), jnp.float32)
    return params


# ----------------------------------------------------------------------------
# Forward pass
# ----------------------------------------------------------------------------
def basic_block_arm_forward(x_nchw, params, stride):
    """Forward pass of BasicBlockArm (training-mode BN). NCHW in / NCHW out."""
    x = jnp.transpose(x_nchw, (0, 2, 3, 1)).astype(jnp.float32)     # NHWC
    n, h, w, c_in = x.shape
    c_out = params["w1"].shape[0]
    c_out_p = _round_up(c_out, LANE)

    # im2col patch extraction (wrapper-side, HBM-materialized).
    # TODO(synk): move im2col into the kernel (halo'd DMA of the NHWC
    # activation) to cut the ~9x HBM read blow-up on the 3x3 convs.
    cols1, (ho, wo) = im2col(x, 3, 3, stride, 1)
    hw = ho * wo
    k_max = max(cols1.shape[-1], 9 * c_out, c_in)
    tile_hw = _choose_tile_hw(hw, k_max, c_out_p)
    hw_pad = _round_up(hw, tile_hw)
    count = n * hw                                   # real rows for BN stats

    # --- conv1 (3x3, stride) + bn1 + relu ------------------------------------
    cols1 = _pad_axis(cols1.astype(jnp.bfloat16), 1, hw_pad)
    w1m = _pad_axis(torch_conv_weight_to_matmul(params["w1"]), 1, c_out_p)
    g1 = _pad_axis(params["g1"], 0, c_out_p)
    b1 = _pad_axis(params["b1"], 0, c_out_p)
    conv1_raw, stats1 = conv_stats(cols1, w1m.astype(jnp.bfloat16), tile_hw)
    scale1, bias1 = bn_fold(stats1, count, g1, b1)
    out1 = bn_apply(conv1_raw, scale1, bias1, tile_hw,
                    apply_relu=True, out_dtype=jnp.bfloat16)

    # --- conv2 (3x3, stride 1) + bn2 (stats) ---------------------------------
    out1_nhwc = out1[:, :hw, :c_out].reshape(n, ho, wo, c_out)
    cols2, _ = im2col(out1_nhwc, 3, 3, 1, 1)
    cols2 = _pad_axis(cols2, 1, hw_pad)
    w2m = _pad_axis(torch_conv_weight_to_matmul(params["w2"]), 1, c_out_p)
    g2 = _pad_axis(params["g2"], 0, c_out_p)
    b2 = _pad_axis(params["b2"], 0, c_out_p)
    conv2_raw, stats2 = conv_stats(cols2, w2m.astype(jnp.bfloat16), tile_hw)
    scale2, bias2 = bn_fold(stats2, count, g2, b2)

    # --- ARM gate -------------------------------------------------------------
    # global_avg_pool(bn2(y)) = scale2 * global_avg_pool(y) + bias2 and the
    # per-sample spatial sums of y are already in stats2 -> the pool is free.
    gap_raw = stats2[:, :, 0, :].sum(axis=1) / float(hw)       # (n, c_out_p)
    pooled = gap_raw * scale2[None, :] + bias2[None, :]
    wa1m = _pad_axis(torch_conv_weight_to_matmul(params["wa1"]), 0, c_out_p)
    wa2m = _pad_axis(torch_conv_weight_to_matmul(params["wa2"]), 1, c_out_p)
    gate = arm_gate(pooled, wa1m, wa2m)                         # (n, c_out_p)

    # --- residual branch + fused bn2 + ARM gating + add + relu ----------------
    if "wd" in params:                 # downsample: 1x1 strided conv + bn
        colsd, _ = im2col(x, 1, 1, stride, 0)
        colsd = _pad_axis(colsd.astype(jnp.bfloat16), 1, hw_pad)
        wdm = _pad_axis(torch_conv_weight_to_matmul(params["wd"]), 1, c_out_p)
        gd = _pad_axis(params["gd"], 0, c_out_p)
        bd = _pad_axis(params["bd"], 0, c_out_p)
        convd_raw, statsd = conv_stats(colsd, wdm.astype(jnp.bfloat16), tile_hw)
        scaled, biasd = bn_fold(statsd, count, gd, bd)
        # Downsample BN is folded INTO the final kernel: no separate residual
        # materialization / extra pass over HBM.
        out = bn_apply(conv2_raw, scale2, bias2, tile_hw,
                       gate=gate, residual=convd_raw,
                       res_scale=scaled, res_bias=biasd,
                       apply_relu=True, out_dtype=jnp.float32)
    else:                              # identity (stride == 1, c_in == c_out)
        residual = _pad_axis(
            _pad_axis(x.reshape(n, h * w, c_in).astype(jnp.bfloat16), 2, c_out_p),
            1, hw_pad)
        out = bn_apply(conv2_raw, scale2, bias2, tile_hw,
                       gate=gate, residual=residual,
                       apply_relu=True, out_dtype=jnp.float32)

    # TODO(synk): BatchNorm running_mean / running_var updates (training-time
    # side effect) are not modeled; only the forward output is reproduced.
    out = out[:, :hw, :c_out].reshape(n, ho, wo, c_out)
    return jnp.transpose(out, (0, 3, 1, 2))                     # back to NCHW


if __name__ == "__main__":
    key = jax.random.PRNGKey(0)
    kx1, kp1, kx2, kp2 = jax.random.split(key, 4)

    # Config A: downsample branch exercised (channel change + stride 2).
    n, c_in, c_out, h, w, stride = 2, 4, 32, 16, 16, 2
    x = jax.random.normal(kx1, (n, c_in, h, w), jnp.float32)    # NCHW input
    params = init_basic_block_arm_params(kp1, c_in, c_out, stride)
    fwd = jax.jit(functools.partial(basic_block_arm_forward, stride=stride))
    out = jax.block_until_ready(fwd(x, params))
    assert out.shape == (n, c_out, h // stride, w // stride), out.shape
    assert bool(jnp.all(jnp.isfinite(out)))

    # Config B: identity residual branch (same channels, stride 1).
    n2, c2, h2 = 2, 32, 8
    x2 = jax.random.normal(kx2, (n2, c2, h2, h2), jnp.float32)
    params2 = init_basic_block_arm_params(kp2, c2, c2, 1)
    out2 = jax.block_until_ready(basic_block_arm_forward(x2, params2, 1))
    assert out2.shape == (n2, c2, h2, h2), out2.shape
    assert bool(jnp.all(jnp.isfinite(out2)))

    print("KERNEL_OK")
</pallas_src>

<mosaic_0001>
module attributes {stable_mosaic.version = 11 : i64} {
  func.func @conv_stats_kernel(%arg0: i32, %arg1: i32, %arg2: memref<1x64x36xbf16, #tpu.memory_space<vmem>>, %arg3: memref<36x128xbf16, #tpu.memory_space<vmem>>, %arg4: memref<1x64x128xbf16, #tpu.memory_space<vmem>>, %arg5: memref<1x1x2x128xf32, #tpu.memory_space<vmem>>) attributes {dimension_semantics = [#tpu.dimension_semantics<parallel>, #tpu.dimension_semantics<parallel>], iteration_bounds = array<i64: 2, 1>, scalar_prefetch = 0 : i64, scratch_operands = 0 : i64, tpu.core_type = #tpu.core_type<tc>, window_params = [{transform_indices = @transform_0, window_bounds = array<i64: 1, 64, 36>}, {pipeline_mode = #tpu.pipeline_mode<synchronous>, transform_indices = @transform_1, window_bounds = array<i64: 36, 128>}, {transform_indices = @transform_2, window_bounds = array<i64: 1, 64, 128>}, {transform_indices = @transform_3, window_bounds = array<i64: 1, 1, 2, 128>}]} {
    %c0 = arith.constant 0 : index
    %c0_0 = arith.constant 0 : index
    %c0_1 = arith.constant 0 : index
    %0 = vector.load %arg2[%c0, %c0_0, %c0_1] : memref<1x64x36xbf16, #tpu.memory_space<vmem>>, vector<1x64x36xbf16>
    %1 = vector.shape_cast %0 : vector<1x64x36xbf16> to vector<64x36xbf16>
    %c0_2 = arith.constant 0 : index
    %c0_3 = arith.constant 0 : index
    %2 = vector.load %arg3[%c0_2, %c0_3] : memref<36x128xbf16, #tpu.memory_space<vmem>>, vector<36x128xbf16>
    %cst = arith.constant dense<0.000000e+00> : vector<64x128xf32>
    %3 = tpu.matmul %1, %2, %cst {dimension_numbers = #tpu.dot_dimension_numbers<[1], [0], [0], [1], [0, 0, 1, 1], [], []>} : vector<64x36xbf16>, vector<36x128xbf16>, vector<64x128xf32> -> vector<64x128xf32>
    %4 = vector.shape_cast %3 : vector<64x128xf32> to vector<1x64x128xf32>
    %5 = arith.truncf %4 : vector<1x64x128xf32> to vector<1x64x128xbf16>
    %c0_4 = arith.constant 0 : index
    %c0_5 = arith.constant 0 : index
    %c0_6 = arith.constant 0 : index
    %6 = vector.load %arg4[%c0_4, %c0_5, %c0_6] : memref<1x64x128xbf16, #tpu.memory_space<vmem>>, vector<1x64x128xbf16>
    tpu.vector_store %arg4[%c0_4, %c0_5, %c0_6], %5 {strides = array<i32>} : memref<1x64x128xbf16, #tpu.memory_space<vmem>>, vector<1x64x128xbf16>,
    %cst_7 = arith.constant dense<0.000000e+00> : vector<128xf32>
    %7 = vector.multi_reduction <add>, %3, %cst_7 [0] : vector<64x128xf32> to vector<128xf32>
    %8 = vector.shape_cast %7 : vector<128xf32> to vector<1x128xf32>
    %9 = arith.mulf %3, %3 : vector<64x128xf32>
    %cst_8 = arith.constant dense<0.000000e+00> : vector<128xf32>
    %10 = vector.multi_reduction <add>, %9, %cst_8 [0] : vector<64x128xf32> to vector<128xf32>
    %11 = vector.shape_cast %10 : vector<128xf32> to vector<1x128xf32>
    %12 = tpu.concatenate %8, %11 in 0 : vector<1x128xf32>, vector<1x128xf32> -> vector<2x128xf32>
    %13 = vector.shape_cast %12 : vector<2x128xf32> to vector<1x1x2x128xf32>
    %c0_9 = arith.constant 0 : index
    %c0_10 = arith.constant 0 : index
    %c0_11 = arith.constant 0 : index
    %c0_12 = arith.constant 0 : index
    %14 = vector.load %arg5[%c0_9, %c0_10, %c0_11, %c0_12] : memref<1x1x2x128xf32, #tpu.memory_space<vmem>>, vector<1x1x2x128xf32>
    tpu.vector_store %arg5[%c0_9, %c0_10, %c0_11, %c0_12], %13 {strides = array<i32>} : memref<1x1x2x128xf32, #tpu.memory_space<vmem>>, vector<1x1x2x128xf32>,
    return
  }
  func.func @transform_0(%arg0: i32, %arg1: i32) -> (i32, i32, i32) {
    %c0_i32 = arith.constant 0 : i32
    %c0_i32_0 = arith.constant 0 : i32
    return %arg0, %arg1, %c0_i32 : i32, i32, i32
  }
  func.func @transform_1(%arg0: i32, %arg1: i32) -> (i32, i32) {
    %c0_i32 = arith.constant 0 : i32
    %c0_i32_0 = arith.constant 0 : i32
    %c0_i32_1 = arith.constant 0 : i32
    return %c0_i32, %c0_i32_0 : i32, i32
  }
  func.func @transform_2(%arg0: i32, %arg1: i32) -> (i32, i32, i32) {
    %c0_i32 = arith.constant 0 : i32
    %c0_i32_0 = arith.constant 0 : i32
    return %arg0, %arg1, %c0_i32 : i32, i32, i32
  }
  func.func @transform_3(%arg0: i32, %arg1: i32) -> (i32, i32, i32, i32) {
    %c0_i32 = arith.constant 0 : i32
    %c0_i32_0 = arith.constant 0 : i32
    %c0_i32_1 = arith.constant 0 : i32
    return %arg0, %arg1, %c0_i32, %c0_i32_0 : i32, i32, i32, i32
  }
}

module attributes {stable_mosaic.version = 11 : i64} {
  func.func @bn_apply_kernel(%arg0: i32, %arg1: i32, %arg2: memref<1x64x128xbf16, #tpu.memory_space<vmem>>, %arg3: memref<1x1x128xf32, #tpu.memory_space<vmem>>, %arg4: memref<1x1x128xf32, #tpu.memory_space<vmem>>, %arg5: memref<1x64x128xbf16, #tpu.memory_space<vmem>>) attributes {dimension_semantics = [#tpu.dimension_semantics<parallel>, #tpu.dimension_semantics<parallel>], iteration_bounds = array<i64: 2, 1>, scalar_prefetch = 0 : i64, scratch_operands = 0 : i64, tpu.core_type = #tpu.core_type<tc>, window_params = [{transform_indices = @transform_0, window_bounds = array<i64: 1, 64, 128>}, {pipeline_mode = #tpu.pipeline_mode<synchronous>, transform_indices = @transform_1, window_bounds = array<i64: 1, 1, 128>}, {pipeline_mode = #tpu.pipeline_mode<synchronous>, transform_indices = @transform_2, window_bounds = array<i64: 1, 1, 128>}, {transform_indices = @transform_3, window_bounds = array<i64: 1, 64, 128>}]} {
    %c0 = arith.constant 0 : index
    %c0_0 = arith.constant 0 : index
    %c0_1 = arith.constant 0 : index
    %0 = vector.load %arg2[%c0, %c0_0, %c0_1] : memref<1x64x128xbf16, #tpu.memory_space<vmem>>, vector<1x64x128xbf16>
    %1 = arith.extf %0 : vector<1x64x128xbf16> to vector<1x64x128xf32>
    %c0_2 = arith.constant 0 : index
    %c0_3 = arith.constant 0 : index
    %c0_4 = arith.constant 0 : index
    %2 = vector.load %arg3[%c0_2, %c0_3, %c0_4] : memref<1x1x128xf32, #tpu.memory_space<vmem>>, vector<1x1x128xf32>
    %3 = vector.broadcast %2 : vector<1x1x128xf32> to vector<1x64x128xf32>
    %4 = arith.mulf %1, %3 : vector<1x64x128xf32>
    %c0_5 = arith.constant 0 : index
    %c0_6 = arith.constant 0 : index
    %c0_7 = arith.constant 0 : index
    %5 = vector.load %arg4[%c0_5, %c0_6, %c0_7] : memref<1x1x128xf32, #tpu.memory_space<vmem>>, vector<1x1x128xf32>
    %6 = vector.broadcast %5 : vector<1x1x128xf32> to vector<1x64x128xf32>
    %7 = arith.addf %4, %6 : vector<1x64x128xf32>
    %cst = arith.constant 0.000000e+00 : f32
    %8 = vector.broadcast %cst : f32 to vector<1x64x128xf32>
    %9 = arith.maximumf %7, %8 : vector<1x64x128xf32>
    %10 = arith.truncf %9 : vector<1x64x128xf32> to vector<1x64x128xbf16>
    %c0_8 = arith.constant 0 : index
    %c0_9 = arith.constant 0 : index
    %c0_10 = arith.constant 0 : index
    %11 = vector.load %arg5[%c0_8, %c0_9, %c0_10] : memref<1x64x128xbf16, #tpu.memory_space<vmem>>, vector<1x64x128xbf16>
    tpu.vector_store %arg5[%c0_8, %c0_9, %c0_10], %10 {strides = array<i32>} : memref<1x64x128xbf16, #tpu.memory_space<vmem>>, vector<1x64x128xbf16>,
    return
  }
  func.func @transform_0(%arg0: i32, %arg1: i32) -> (i32, i32, i32) {
    %c0_i32 = arith.constant 0 : i32
    %c0_i32_0 = arith.constant 0 : i32
    return %arg0, %arg1, %c0_i32 : i32, i32, i32
  }
  func.func @transform_1(%arg0: i32, %arg1: i32) -> (i32, i32, i32) {
    %c0_i32 = arith.constant 0 : i32
    %c0_i32_0 = arith.constant 0 : i32
    %c0_i32_1 = arith.constant 0 : i32
    %c0_i32_2 = arith.constant 0 : i32
    return %c0_i32, %c0_i32_0, %c0_i32_1 : i32, i32, i32
  }
  func.func @transform_2(%arg0: i32, %arg1: i32) -> (i32, i32, i32) {
    %c0_i32 = arith.constant 0 : i32
    %c0_i32_0 = arith.constant 0 : i32
    %c0_i32_1 = arith.constant 0 : i32
    %c0_i32_2 = arith.constant 0 : i32
    return %c0_i32, %c0_i32_0, %c0_i32_1 : i32, i32, i32
  }
  func.func @transform_3(%arg0: i32, %arg1: i32) -> (i32, i32, i32) {
    %c0_i32 = arith.constant 0 : i32
    %c0_i32_0 = arith.constant 0 : i32
    return %arg0, %arg1, %c0_i32 : i32, i32, i32
  }
}

module attributes {stable_mosaic.version = 11 : i64} {
  func.func @conv_stats_kernel(%arg0: i32, %arg1: i32, %arg2: memref<1x64x288xbf16, #tpu.memory_space<vmem>>, %arg3: memref<288x128xbf16, #tpu.memory_space<vmem>>, %arg4: memref<1x64x128xbf16, #tpu.memory_space<vmem>>, %arg5: memref<1x1x2x128xf32, #tpu.memory_space<vmem>>) attributes {dimension_semantics = [#tpu.dimension_semantics<parallel>, #tpu.dimension_semantics<parallel>], iteration_bounds = array<i64: 2, 1>, scalar_prefetch = 0 : i64, scratch_operands = 0 : i64, tpu.core_type = #tpu.core_type<tc>, window_params = [{transform_indices = @transform_0, window_bounds = array<i64: 1, 64, 288>}, {pipeline_mode = #tpu.pipeline_mode<synchronous>, transform_indices = @transform_1, window_bounds = array<i64: 288, 128>}, {transform_indices = @transform_2, window_bounds = array<i64: 1, 64, 128>}, {transform_indices = @transform_3, window_bounds = array<i64: 1, 1, 2, 128>}]} {
    %c0 = arith.constant 0 : index
    %c0_0 = arith.constant 0 : index
    %c0_1 = arith.constant 0 : index
    %0 = vector.load %arg2[%c0, %c0_0, %c0_1] : memref<1x64x288xbf16, #tpu.memory_space<vmem>>, vector<1x64x288xbf16>
    %1 = vector.shape_cast %0 : vector<1x64x288xbf16> to vector<64x288xbf16>
    %c0_2 = arith.constant 0 : index
    %c0_3 = arith.constant 0 : index
    %2 = vector.load %arg3[%c0_2, %c0_3] : memref<288x128xbf16, #tpu.memory_space<vmem>>, vector<288x128xbf16>
    %cst = arith.constant dense<0.000000e+00> : vector<64x128xf32>
    %3 = tpu.matmul %1, %2, %cst {dimension_numbers = #tpu.dot_dimension_numbers<[1], [0], [0], [1], [0, 0, 1, 1], [], []>} : vector<64x288xbf16>, vector<288x128xbf16>, vector<64x128xf32> -> vector<64x128xf32>
    %4 = vector.shape_cast %3 : vector<64x128xf32> to vector<1x64x128xf32>
    %5 = arith.truncf %4 : vector<1x64x128xf32> to vector<1x64x128xbf16>
    %c0_4 = arith.constant 0 : index
    %c0_5 = arith.constant 0 : index
    %c0_6 = arith.constant 0 : index
    %6 = vector.load %arg4[%c0_4, %c0_5, %c0_6] : memref<1x64x128xbf16, #tpu.memory_space<vmem>>, vector<1x64x128xbf16>
    tpu.vector_store %arg4[%c0_4, %c0_5, %c0_6], %5 {strides = array<i32>} : memref<1x64x128xbf16, #tpu.memory_space<vmem>>, vector<1x64x128xbf16>,
    %cst_7 = arith.constant dense<0.000000e+00> : vector<128xf32>
    %7 = vector.multi_reduction <add>, %3, %cst_7 [0] : vector<64x128xf32> to vector<128xf32>
    %8 = vector.shape_cast %7 : vector<128xf32> to vector<1x128xf32>
    %9 = arith.mulf %3, %3 : vector<64x128xf32>
    %cst_8 = arith.constant dense<0.000000e+00> : vector<128xf32>
    %10 = vector.multi_reduction <add>, %9, %cst_8 [0] : vector<64x128xf32> to vector<128xf32>
    %11 = vector.shape_cast %10 : vector<128xf32> to vector<1x128xf32>
    %12 = tpu.concatenate %8, %11 in 0 : vector<1x128xf32>, vector<1x128xf32> -> vector<2x128xf32>
    %13 = vector.shape_cast %12 : vector<2x128xf32> to vector<1x1x2x128xf32>
    %c0_9 = arith.constant 0 : index
    %c0_10 = arith.constant 0 : index
    %c0_11 = arith.constant 0 : index
    %c0_12 = arith.constant 0 : index
    %14 = vector.load %arg5[%c0_9, %c0_10, %c0_11, %c0_12] : memref<1x1x2x128xf32, #tpu.memory_space<vmem>>, vector<1x1x2x128xf32>
    tpu.vector_store %arg5[%c0_9, %c0_10, %c0_11, %c0_12], %13 {strides = array<i32>} : memref<1x1x2x128xf32, #tpu.memory_space<vmem>>, vector<1x1x2x128xf32>,
    return
  }
  func.func @transform_0(%arg0: i32, %arg1: i32) -> (i32, i32, i32) {
    %c0_i32 = arith.constant 0 : i32
    %c0_i32_0 = arith.constant 0 : i32
    return %arg0, %arg1, %c0_i32 : i32, i32, i32
  }
  func.func @transform_1(%arg0: i32, %arg1: i32) -> (i32, i32) {
    %c0_i32 = arith.constant 0 : i32
    %c0_i32_0 = arith.constant 0 : i32
    %c0_i32_1 = arith.constant 0 : i32
    return %c0_i32, %c0_i32_0 : i32, i32
  }
  func.func @transform_2(%arg0: i32, %arg1: i32) -> (i32, i32, i32) {
    %c0_i32 = arith.constant 0 : i32
    %c0_i32_0 = arith.constant 0 : i32
    return %arg0, %arg1, %c0_i32 : i32, i32, i32
  }
  func.func @transform_3(%arg0: i32, %arg1: i32) -> (i32, i32, i32, i32) {
    %c0_i32 = arith.constant 0 : i32
    %c0_i32_0 = arith.constant 0 : i32
    %c0_i32_1 = arith.constant 0 : i32
    return %arg0, %arg1, %c0_i32, %c0_i32_0 : i32, i32, i32, i32
  }
}

module attributes {stable_mosaic.version = 11 : i64} {
  func.func @arm_gate_kernel(%arg0: memref<2x128xf32, #tpu.memory_space<vmem>>, %arg1: memref<128x2xf32, #tpu.memory_space<vmem>>, %arg2: memref<2x128xf32, #tpu.memory_space<vmem>>, %arg3: memref<2x128xf32, #tpu.memory_space<vmem>>) attributes {dimension_semantics = [], scalar_prefetch = 0 : i64, scratch_operands = 0 : i64, tpu.core_type = #tpu.core_type<tc>} {
    %c0 = arith.constant 0 : index
    %c0_0 = arith.constant 0 : index
    %0 = vector.load %arg0[%c0, %c0_0] : memref<2x128xf32, #tpu.memory_space<vmem>>, vector<2x128xf32>
    %c0_1 = arith.constant 0 : index
    %c0_2 = arith.constant 0 : index
    %1 = vector.load %arg1[%c0_1, %c0_2] : memref<128x2xf32, #tpu.memory_space<vmem>>, vector<128x2xf32>
    %cst = arith.constant dense<0.000000e+00> : vector<2x2xf32>
    %2 = tpu.matmul %0, %1, %cst {dimension_numbers = #tpu.dot_dimension_numbers<[1], [0], [0], [1], [0, 0, 1, 1], [], []>} : vector<2x128xf32>, vector<128x2xf32>, vector<2x2xf32> -> vector<2x2xf32>
    %cst_3 = arith.constant 0.000000e+00 : f32
    %3 = vector.broadcast %cst_3 : f32 to vector<2x2xf32>
    %4 = arith.maximumf %2, %3 : vector<2x2xf32>
    %c0_4 = arith.constant 0 : index
    %c0_5 = arith.constant 0 : index
    %5 = vector.load %arg2[%c0_4, %c0_5] : memref<2x128xf32, #tpu.memory_space<vmem>>, vector<2x128xf32>
    %cst_6 = arith.constant dense<0.000000e+00> : vector<2x128xf32>
    %6 = tpu.matmul %4, %5, %cst_6 {dimension_numbers = #tpu.dot_dimension_numbers<[1], [0], [0], [1], [0, 0, 1, 1], [], []>} : vector<2x2xf32>, vector<2x128xf32>, vector<2x128xf32> -> vector<2x128xf32>
    %cst_7 = arith.constant 0.000000e+00 : f32
    %7 = vector.broadcast %cst_7 : f32 to vector<2x128xf32>
    %8 = arith.subf %7, %6 : vector<2x128xf32>
    %9 = math.exp %8 : vector<2x128xf32>
    %cst_8 = arith.constant 1.000000e+00 : f32
    %10 = vector.broadcast %cst_8 : f32 to vector<2x128xf32>
    %11 = arith.addf %10, %9 : vector<2x128xf32>
    %cst_9 = arith.constant 1.000000e+00 : f32
    %12 = vector.broadcast %cst_9 : f32 to vector<2x128xf32>
    %13 = arith.divf %12, %11 : vector<2x128xf32>
    %c0_10 = arith.constant 0 : index
    %c0_11 = arith.constant 0 : index
    %14 = vector.load %arg3[%c0_10, %c0_11] : memref<2x128xf32, #tpu.memory_space<vmem>>, vector<2x128xf32>
    tpu.vector_store %arg3[%c0_10, %c0_11], %13 {strides = array<i32>} : memref<2x128xf32, #tpu.memory_space<vmem>>, vector<2x128xf32>,
    return
  }
}

module attributes {stable_mosaic.version = 11 : i64} {
  func.func @conv_stats_kernel(%arg0: i32, %arg1: i32, %arg2: memref<1x64x4xbf16, #tpu.memory_space<vmem>>, %arg3: memref<4x128xbf16, #tpu.memory_space<vmem>>, %arg4: memref<1x64x128xbf16, #tpu.memory_space<vmem>>, %arg5: memref<1x1x2x128xf32, #tpu.memory_space<vmem>>) attributes {dimension_semantics = [#tpu.dimension_semantics<parallel>, #tpu.dimension_semantics<parallel>], iteration_bounds = array<i64: 2, 1>, scalar_prefetch = 0 : i64, scratch_operands = 0 : i64, tpu.core_type = #tpu.core_type<tc>, window_params = [{transform_indices = @transform_0, window_bounds = array<i64: 1, 64, 4>}, {pipeline_mode = #tpu.pipeline_mode<synchronous>, transform_indices = @transform_1, window_bounds = array<i64: 4, 128>}, {transform_indices = @transform_2, window_bounds = array<i64: 1, 64, 128>}, {transform_indices = @transform_3, window_bounds = array<i64: 1, 1, 2, 128>}]} {
    %c0 = arith.constant 0 : index
    %c0_0 = arith.constant 0 : index
    %c0_1 = arith.constant 0 : index
    %0 = vector.load %arg2[%c0, %c0_0, %c0_1] : memref<1x64x4xbf16, #tpu.memory_space<vmem>>, vector<1x64x4xbf16>
    %1 = vector.shape_cast %0 : vector<1x64x4xbf16> to vector<64x4xbf16>
    %c0_2 = arith.constant 0 : index
    %c0_3 = arith.constant 0 : index
    %2 = vector.load %arg3[%c0_2, %c0_3] : memref<4x128xbf16, #tpu.memory_space<vmem>>, vector<4x128xbf16>
    %cst = arith.constant dense<0.000000e+00> : vector<64x128xf32>
    %3 = tpu.matmul %1, %2, %cst {dimension_numbers = #tpu.dot_dimension_numbers<[1], [0], [0], [1], [0, 0, 1, 1], [], []>} : vector<64x4xbf16>, vector<4x128xbf16>, vector<64x128xf32> -> vector<64x128xf32>
    %4 = vector.shape_cast %3 : vector<64x128xf32> to vector<1x64x128xf32>
    %5 = arith.truncf %4 : vector<1x64x128xf32> to vector<1x64x128xbf16>
    %c0_4 = arith.constant 0 : index
    %c0_5 = arith.constant 0 : index
    %c0_6 = arith.constant 0 : index
    %6 = vector.load %arg4[%c0_4, %c0_5, %c0_6] : memref<1x64x128xbf16, #tpu.memory_space<vmem>>, vector<1x64x128xbf16>
    tpu.vector_store %arg4[%c0_4, %c0_5, %c0_6], %5 {strides = array<i32>} : memref<1x64x128xbf16, #tpu.memory_space<vmem>>, vector<1x64x128xbf16>,
    %cst_7 = arith.constant dense<0.000000e+00> : vector<128xf32>
    %7 = vector.multi_reduction <add>, %3, %cst_7 [0] : vector<64x128xf32> to vector<128xf32>
    %8 = vector.shape_cast %7 : vector<128xf32> to vector<1x128xf32>
    %9 = arith.mulf %3, %3 : vector<64x128xf32>
    %cst_8 = arith.constant dense<0.000000e+00> : vector<128xf32>
    %10 = vector.multi_reduction <add>, %9, %cst_8 [0] : vector<64x128xf32> to vector<128xf32>
    %11 = vector.shape_cast %10 : vector<128xf32> to vector<1x128xf32>
    %12 = tpu.concatenate %8, %11 in 0 : vector<1x128xf32>, vector<1x128xf32> -> vector<2x128xf32>
    %13 = vector.shape_cast %12 : vector<2x128xf32> to vector<1x1x2x128xf32>
    %c0_9 = arith.constant 0 : index
    %c0_10 = arith.constant 0 : index
    %c0_11 = arith.constant 0 : index
    %c0_12 = arith.constant 0 : index
    %14 = vector.load %arg5[%c0_9, %c0_10, %c0_11, %c0_12] : memref<1x1x2x128xf32, #tpu.memory_space<vmem>>, vector<1x1x2x128xf32>
    tpu.vector_store %arg5[%c0_9, %c0_10, %c0_11, %c0_12], %13 {strides = array<i32>} : memref<1x1x2x128xf32, #tpu.memory_space<vmem>>, vector<1x1x2x128xf32>,
    return
  }
  func.func @transform_0(%arg0: i32, %arg1: i32) -> (i32, i32, i32) {
    %c0_i32 = arith.constant 0 : i32
    %c0_i32_0 = arith.constant 0 : i32
    return %arg0, %arg1, %c0_i32 : i32, i32, i32
  }
  func.func @transform_1(%arg0: i32, %arg1: i32) -> (i32, i32) {
    %c0_i32 = arith.constant 0 : i32
    %c0_i32_0 = arith.constant 0 : i32
    %c0_i32_1 = arith.constant 0 : i32
    return %c0_i32, %c0_i32_0 : i32, i32
  }
  func.func @transform_2(%arg0: i32, %arg1: i32) -> (i32, i32, i32) {
    %c0_i32 = arith.constant 0 : i32
    %c0_i32_0 = arith.constant 0 : i32
    return %arg0, %arg1, %c0_i32 : i32, i32, i32
  }
  func.func @transform_3(%arg0: i32, %arg1: i32) -> (i32, i32, i32, i32) {
    %c0_i32 = arith.constant 0 : i32
    %c0_i32_0 = arith.constant 0 : i32
    %c0_i32_1 = arith.constant 0 : i32
    return %arg0, %arg1, %c0_i32, %c0_i32_0 : i32, i32, i32, i32
  }
}

module attributes {stable_mosaic.version = 11 : i64} {
  func.func @bn_apply_kernel(%arg0: i32, %arg1: i32, %arg2: memref<1x64x128xbf16, #tpu.memory_space<vmem>>, %arg3: memref<1x1x128xf32, #tpu.memory_space<vmem>>, %arg4: memref<1x1x128xf32, #tpu.memory_space<vmem>>, %arg5: memref<1x1x128xf32, #tpu.memory_space<vmem>>, %arg6: memref<1x64x128xbf16, #tpu.memory_space<vmem>>, %arg7: memref<1x1x128xf32, #tpu.memory_space<vmem>>, %arg8: memref<1x1x128xf32, #tpu.memory_space<vmem>>, %arg9: memref<1x64x128xf32, #tpu.memory_space<vmem>>) attributes {dimension_semantics = [#tpu.dimension_semantics<parallel>, #tpu.dimension_semantics<parallel>], iteration_bounds = array<i64: 2, 1>, scalar_prefetch = 0 : i64, scratch_operands = 0 : i64, tpu.core_type = #tpu.core_type<tc>, window_params = [{transform_indices = @transform_0, window_bounds = array<i64: 1, 64, 128>}, {pipeline_mode = #tpu.pipeline_mode<synchronous>, transform_indices = @transform_1, window_bounds = array<i64: 1, 1, 128>}, {pipeline_mode = #tpu.pipeline_mode<synchronous>, transform_indices = @transform_2, window_bounds = array<i64: 1, 1, 128>}, {transform_indices = @transform_3, window_bounds = array<i64: 1, 1, 128>}, {transform_indices = @transform_4, window_bounds = array<i64: 1, 64, 128>}, {pipeline_mode = #tpu.pipeline_mode<synchronous>, transform_indices = @transform_5, window_bounds = array<i64: 1, 1, 128>}, {pipeline_mode = #tpu.pipeline_mode<synchronous>, transform_indices = @transform_6, window_bounds = array<i64: 1, 1, 128>}, {transform_indices = @transform_7, window_bounds = array<i64: 1, 64, 128>}]} {
    %c0 = arith.constant 0 : index
    %c0_0 = arith.constant 0 : index
    %c0_1 = arith.constant 0 : index
    %0 = vector.load %arg2[%c0, %c0_0, %c0_1] : memref<1x64x128xbf16, #tpu.memory_space<vmem>>, vector<1x64x128xbf16>
    %1 = arith.extf %0 : vector<1x64x128xbf16> to vector<1x64x128xf32>
    %c0_2 = arith.constant 0 : index
    %c0_3 = arith.constant 0 : index
    %c0_4 = arith.constant 0 : index
    %2 = vector.load %arg3[%c0_2, %c0_3, %c0_4] : memref<1x1x128xf32, #tpu.memory_space<vmem>>, vector<1x1x128xf32>
    %3 = vector.broadcast %2 : vector<1x1x128xf32> to vector<1x64x128xf32>
    %4 = arith.mulf %1, %3 : vector<1x64x128xf32>
    %c0_5 = arith.constant 0 : index
    %c0_6 = arith.constant 0 : index
    %c0_7 = arith.constant 0 : index
    %5 = vector.load %arg4[%c0_5, %c0_6, %c0_7] : memref<1x1x128xf32, #tpu.memory_space<vmem>>, vector<1x1x128xf32>
    %6 = vector.broadcast %5 : vector<1x1x128xf32> to vector<1x64x128xf32>
    %7 = arith.addf %4, %6 : vector<1x64x128xf32>
    %c0_8 = arith.constant 0 : index
    %c0_9 = arith.constant 0 : index
    %c0_10 = arith.constant 0 : index
    %8 = vector.load %arg5[%c0_8, %c0_9, %c0_10] : memref<1x1x128xf32, #tpu.memory_space<vmem>>, vector<1x1x128xf32>
    %9 = vector.broadcast %8 : vector<1x1x128xf32> to vector<1x64x128xf32>
    %10 = arith.mulf %7, %9 : vector<1x64x128xf32>
    %c0_11 = arith.constant 0 : index
    %c0_12 = arith.constant 0 : index
    %c0_13 = arith.constant 0 : index
    %11 = vector.load %arg6[%c0_11, %c0_12, %c0_13] : memref<1x64x128xbf16, #tpu.memory_space<vmem>>, vector<1x64x128xbf16>
    %12 = arith.extf %11 : vector<1x64x128xbf16> to vector<1x64x128xf32>
    %c0_14 = arith.constant 0 : index
    %c0_15 = arith.constant 0 : index
    %c0_16 = arith.constant 0 : index
    %13 = vector.load %arg7[%c0_14, %c0_15, %c0_16] : memref<1x1x128xf32, #tpu.memory_space<vmem>>, vector<1x1x128xf32>
    %14 = vector.broadcast %13 : vector<1x1x128xf32> to vector<1x64x128xf32>
    %15 = arith.mulf %12, %14 : vector<1x64x128xf32>
    %c0_17 = arith.constant 0 : index
    %c0_18 = arith.constant 0 : index
    %c0_19 = arith.constant 0 : index
    %16 = vector.load %arg8[%c0_17, %c0_18, %c0_19] : memref<1x1x128xf32, #tpu.memory_space<vmem>>, vector<1x1x128xf32>
    %17 = vector.broadcast %16 : vector<1x1x128xf32> to vector<1x64x128xf32>
    %18 = arith.addf %15, %17 : vector<1x64x128xf32>
    %19 = arith.addf %10, %18 : vector<1x64x128xf32>
    %cst = arith.constant 0.000000e+00 : f32
    %20 = vector.broadcast %cst : f32 to vector<1x64x128xf32>
    %21 = arith.maximumf %19, %20 : vector<1x64x128xf32>
    %c0_20 = arith.constant 0 : index
    %c0_21 = arith.constant 0 : index
    %c0_22 = arith.constant 0 : index
    %22 = vector.load %arg9[%c0_20, %c0_21, %c0_22] : memref<1x64x128xf32, #tpu.memory_space<vmem>>, vector<1x64x128xf32>
    tpu.vector_store %arg9[%c0_20, %c0_21, %c0_22], %21 {strides = array<i32>} : memref<1x64x128xf32, #tpu.memory_space<vmem>>, vector<1x64x128xf32>,
    return
  }
  func.func @transform_0(%arg0: i32, %arg1: i32) -> (i32, i32, i32) {
    %c0_i32 = arith.constant 0 : i32
    %c0_i32_0 = arith.constant 0 : i32
    return %arg0, %arg1, %c0_i32 : i32, i32, i32
  }
  func.func @transform_1(%arg0: i32, %arg1: i32) -> (i32, i32, i32) {
    %c0_i32 = arith.constant 0 : i32
    %c0_i32_0 = arith.constant 0 : i32
    %c0_i32_1 = arith.constant 0 : i32
    %c0_i32_2 = arith.constant 0 : i32
    return %c0_i32, %c0_i32_0, %c0_i32_1 : i32, i32, i32
  }
  func.func @transform_2(%arg0: i32, %arg1: i32) -> (i32, i32, i32) {
    %c0_i32 = arith.constant 0 : i32
    %c0_i32_0 = arith.constant 0 : i32
    %c0_i32_1 = arith.constant 0 : i32
    %c0_i32_2 = arith.constant 0 : i32
    return %c0_i32, %c0_i32_0, %c0_i32_1 : i32, i32, i32
  }
  func.func @transform_3(%arg0: i32, %arg1: i32) -> (i32, i32, i32) {
    %c0_i32 = arith.constant 0 : i32
    %c0_i32_0 = arith.constant 0 : i32
    %c0_i32_1 = arith.constant 0 : i32
    return %arg0, %c0_i32, %c0_i32_0 : i32, i32, i32
  }
  func.func @transform_4(%arg0: i32, %arg1: i32) -> (i32, i32, i32) {
    %c0_i32 = arith.constant 0 : i32
    %c0_i32_0 = arith.constant 0 : i32
    return %arg0, %arg1, %c0_i32 : i32, i32, i32
  }
  func.func @transform_5(%arg0: i32, %arg1: i32) -> (i32, i32, i32) {
    %c0_i32 = arith.constant 0 : i32
    %c0_i32_0 = arith.constant 0 : i32
    %c0_i32_1 = arith.constant 0 : i32
    %c0_i32_2 = arith.constant 0 : i32
    return %c0_i32, %c0_i32_0, %c0_i32_1 : i32, i32, i32
  }
  func.func @transform_6(%arg0: i32, %arg1: i32) -> (i32, i32, i32) {
    %c0_i32 = arith.constant 0 : i32
    %c0_i32_0 = arith.constant 0 : i32
    %c0_i32_1 = arith.constant 0 : i32
    %c0_i32_2 = arith.constant 0 : i32
    return %c0_i32, %c0_i32_0, %c0_i32_1 : i32, i32, i32
  }
  func.func @transform_7(%arg0: i32, %arg1: i32) -> (i32, i32, i32) {
    %c0_i32 = arith.constant 0 : i32
    %c0_i32_0 = arith.constant 0 : i32
    return %arg0, %arg1, %c0_i32 : i32, i32, i32
  }
}

</mosaic_0001>

<bundles_post_ra>
// kernel: basic_block_arm_forward.7
= control target key start
LH: loop header
LB: loop body
LE: loop exit
PB: predicated region body
PF: predicated region fallthrough
CT: control target
= control target key end

     0   :  { %s486_s12 = smov 0   ;;  %s488_s13 = smov 0   ;;  %s532_s0 = inlined_call_operand.vmem [shape: bf16[2,64,128], index: 0, kind: input, shape index: {}]   ;;  %s533_s1 = inlined_call_operand.vmem [shape: f32[1,1,128], index: 1, kind: input, shape index: {}]   ;;  %s534_s2 = inlined_call_operand.vmem [shape: f32[1,1,128], index: 2, kind: input, shape index: {}]   ;;  %s535_s3 = inlined_call_operand.vmem [shape: bf16[2,64,128], index: 3, kind: output, shape index: {}]  }
   0x1   :  { %s490_s14 = smov 0  }
   0x2 LB: > { %s25_s15 = sadd.s32 1, %s460_s13  ;;  %p365_p0 = scmp.ge.s32.totalorder %s464_s14, 1  ;;  %s464_s14 = sphi %s490_s14, %s13_s14   ;;  %s460_s13 = sphi %s488_s13, %s537_s13   ;;  %s456_s12 = sphi %s486_s12, %s536_s12  }
   0x3   : > { %p27_p1 = scmp.ge.s32.totalorder %s25_s15, 2  ;;  %p158_p2 = scmp.lt.s32.totalorder %s464_s14, 3 }
   0x5   : > { %s539_s15 = smov (%p27_p1, %s25_s15), 0  ;;  %p159_p3 = pnand %p365_p0, %p158_p2 }
   0x6   : > { %p191_p4 = scmp.lt.s32.totalorder (!%p159_p3), %s456_s12, 1 }
   0x7   : > { %162 = sbr.rel (%p159_p3) target bundleno = 30 (0x1e), region = 32 }
   0xc   : > { %s541_s12 = smov (!%p191_p4, %s456_s12), 1  ;;  %v440_v0 = vld [vmem:[%s533_s1] ss:$0 sm:$0xff] }
   0xd   : > { %s372_s16 = sshll.u32 %s541_s12, 5  ;;  %v441_v6 = vld [vmem:[%s534_s2] ss:$0 sm:$0xff] }
   0xe   : > { %s198_s19 = scalar_lea.vmem %s532_s0, %s372_s16  ;;  %s208_s26 = scalar_lea.vmem %s535_s3, %s372_s16 }
   0xf   : > { %v375_v1 = vld [vmem:[%s198_s19] sm:$0xff]   ;;  %v410_v2 = vld [vmem:[%s198_s19 + $0x8] sm:$0xff]   ;;  %v411_v3 = vld [vmem:[%s198_s19 + $0x10] sm:$0xff]  }
  0x10   : > { %v376_v4 = vunpack.c.l.bf16 %v375_v1  ;;  %v377_v5 = vunpack.c.h.bf16 %v375_v1  ;;  %v380_v7 = vunpack.c.l.bf16 %v410_v2  ;;  %v381_v8 = vunpack.c.h.bf16 %v410_v2  ;;  %v412_v9 = vld [vmem:[%s198_s19 + $0x18] sm:$0xff]  }
  0x11   : > { %v384_v10 = vunpack.c.l.bf16 %v411_v3  ;;  %v385_v11 = vunpack.c.h.bf16 %v411_v3  ;;  %v388_v12 = vunpack.c.l.bf16 %v412_v9  ;;  %v389_v13 = vunpack.c.h.bf16 %v412_v9 }
  0x12   : > { %v230_v14 = vmul.f32 %v440_v0, %v376_v4  ;;  %v231_v15 = vmul.f32 %v440_v0, %v377_v5  ;;  %v232_v16 = vmul.f32 %v440_v0, %v380_v7  ;;  %v233_v17 = vmul.f32 %v440_v0, %v381_v8 }
  0x13   : > { %v234_v18 = vmul.f32 %v440_v0, %v384_v10  ;;  %v235_v19 = vmul.f32 %v440_v0, %v385_v11  ;;  %v236_v20 = vmul.f32 %v440_v0, %v388_v12  ;;  %v237_v21 = vmul.f32 %v440_v0, %v389_v13 }
  0x14   : > { %v242_v22 = vadd.f32 %v441_v6, %v230_v14  ;;  %v243_v23 = vadd.f32 %v441_v6, %v231_v15  ;;  %v244_v24 = vadd.f32 %v441_v6, %v232_v16  ;;  %v245_v25 = vadd.f32 %v441_v6, %v233_v17 }
  0x15   : > { %v246_v26 = vadd.f32 %v441_v6, %v234_v18  ;;  %v247_v27 = vadd.f32 %v441_v6, %v235_v19  ;;  %v248_v28 = vadd.f32 %v441_v6, %v236_v20  ;;  %v249_v29 = vadd.f32 %v441_v6, %v237_v21 }
  0x16   : > { %v250_v30 = vmax.f32 %v242_v22, 0.0  ;;  %v251_v31 = vmax.f32 %v243_v23, 0.0  ;;  %v252_v32 = vmax.f32 %v244_v24, 0.0  ;;  %v253_v33 = vmax.f32 %v245_v25, 0.0 }
  0x17   : > { %v254_v34 = vmax.f32 %v246_v26, 0.0  ;;  %v255_v35 = vmax.f32 %v247_v27, 0.0  ;;  %v256_v36 = vmax.f32 %v248_v28, 0.0  ;;  %v257_v37 = vmax.f32 %v249_v29, 0.0 }
  0x18   : > { %v393_v38 = vpack.c.bf16 %v251_v31, %v250_v30  ;;  %v398_v39 = vpack.c.bf16 %v253_v33, %v252_v32 }
  0x19   : > { %v403_v40 = vpack.c.bf16 %v255_v35, %v254_v34  ;;  %v408_v41 = vpack.c.bf16 %v257_v37, %v256_v36 }
  0x1a   : > { %394 = vst [vmem:[%s208_s26] sm:$0xff] %v393_v38  }
  0x1b   : > { %413 = vst [vmem:[%s208_s26 + $0x8] sm:$0xff] %v398_v39  }
  0x1c   : > { %414 = vst [vmem:[%s208_s26 + $0x10] sm:$0xff] %v403_v40  }
  0x1d   : > { %415 = vst [vmem:[%s208_s26 + $0x18] sm:$0xff] %v408_v41  }
  0x1e PF: > { %s13_s14 = sadd.s32 1, %s464_s14   ;;  %s536_s12 = smov %s460_s13 }
  0x1f   : > { %p10_p5 = scmp.ge.s32.totalorder %s13_s14, 4   ;;  %s537_s13 = smov %s539_s15 }
  0x21   :  { %12 = sbr.rel (!%p10_p5) target bundleno = 2 (0x2), region = 62 }

// kernel: basic_block_arm_forward.6
= control target key start
LH: loop header
LB: loop body
LE: loop exit
PB: predicated region body
PF: predicated region fallthrough
CT: control target
= control target key end

     0   :  { %s653_s12 = smov 0   ;;  %s655_s13 = smov 0   ;;  %s702_s0 = inlined_call_operand.vmem [shape: bf16[2,64,36], index: 0, kind: input, shape index: {}]   ;;  %s703_s1 = inlined_call_operand.vmem [shape: bf16[36,128], index: 1, kind: input, shape index: {}]   ;;  %s704_s2 = inlined_call_operand.vmem [shape: bf16[2,64,128], index: 2, kind: output, shape index: {0}]   ;;  %s705_s3 = inlined_call_operand.vmem [shape: f32[2,1,2,128], index: 3, kind: output, shape index: {1}]  }
   0x1   :  { %s657_s14 = smov 0  }
   0x2 LB: > { %s26_s15 = sadd.s32 1, %s627_s13  ;;  %p509_p0 = scmp.ge.s32.totalorder %s631_s14, 1  ;;  %s631_s14 = sphi %s657_s14, %s14_s14   ;;  %s627_s13 = sphi %s655_s13, %s707_s13   ;;  %s623_s12 = sphi %s653_s12, %s706_s12  }
   0x3   : > { %p28_p1 = scmp.ge.s32.totalorder %s26_s15, 2  ;;  %p163_p2 = scmp.lt.s32.totalorder %s631_s14, 3 }
   0x5   : > { %s709_s15 = smov (%p28_p1, %s26_s15), 0  ;;  %p164_p3 = pnand %p509_p0, %p163_p2 }
   0x6   : > { %p203_p4 = scmp.lt.s32.totalorder (!%p164_p3), %s623_s12, 1 }
   0x7   : > { %167 = sbr.rel (%p164_p3) target bundleno = 193 (0xc1), region = 28 }
   0xc   : > { %v242_v0 = vld [vmem:[%s703_s1 + $0x10] sm:$0x3]  ;;  %vm291_vm0 = vcmask 1041408   ;;  %s711_s12 = smov (!%p203_p4, %s623_s12), 1  ;;  %v552_v4 = vld [vmem:[%s703_s1 + $0x8] sm:$0xff]  ;;  %v551_v5 = vld [vmem:[%s703_s1] sm:$0xff] }
   0xd   : > { %v272_v1 = vunpack.c.l.b16 %v242_v0  ;;  %s545_s20 = sshll.u32 %s711_s12, 5  ;;  %vm278_vm1 = vcmask 293888   ;;  %s514_s29 = sshll.u32 %s711_s12, 1  ;;  %vm374_vm2 = vcmask 1040384  }
   0xe   : > { %s210_s25 = scalar_lea.vmem %s702_s0, %s545_s20  ;;  %s220_s28 = scalar_lea.vmem %s704_s2, %s545_s20 }
   0xf   : > { %v275_v2 = vpack.c.b16 %v272_v1, %v272_v1  ;;  %v547_v6 = vld [vmem:[%s210_s25] sm:$0xff]  ;;  %v548_v7 = vld [vmem:[%s210_s25 + $0x8] sm:$0xff]  ;;  %v549_v8 = vld [vmem:[%s210_s25 + $0x10] sm:$0xff]  ;;  %s228_s5 = scalar_lea.vmem %s705_s3, %s514_s29 }
  0x10   : > { %v550_v9 = vld [vmem:[%s210_s25 + $0x18] sm:$0xff] }
  0x11   : > { %v293_v3 = vsel %vm291_vm0, %v275_v2, 0 }
  0x12   : > { %300 = vmatpush.bf16.msra.mxu0 %v293_v3  ;;  %576 = vmatpush.bf16.msra.mxu1 %v293_v3 }
  0x13   : > { %577 = vmatpush.bf16.msra.mxu2 %v293_v3  ;;  %578 = vmatpush.bf16.msra.mxu3 %v293_v3 }
  0x16   : > { %301 = vmatpush.bf16.msra.mxu0 %v552_v4  ;;  %579 = vmatpush.bf16.msra.mxu1 %v552_v4 }
  0x17   : > { %580 = vmatpush.bf16.msra.mxu2 %v552_v4  ;;  %581 = vmatpush.bf16.msra.mxu3 %v552_v4 }
  0x1a   : > { %302 = vmatpush.bf16.msra.mxu0 %v551_v5  ;;  %582 = vmatpush.bf16.msra.mxu1 %v551_v5 }
  0x1b   : > { %583 = vmatpush.bf16.msra.mxu2 %v551_v5  ;;  %584 = vmatpush.bf16.msra.mxu3 %v551_v5 }
  0x1d   : > { %539 = vmatmul.msk.bf16.vlgmr.msra.gmra.mxu0 %vm278_vm1, %v547_v6  ;;  %540 = vmatmul.msk.bf16.vlgmr.msra.gmra.mxu1 %vm278_vm1, %v548_v7 }
  0x1e   : > { %541 = vmatmul.msk.bf16.vlgmr.msra.gmra.mxu2 %vm278_vm1, %v549_v8  ;;  %542 = vmatmul.msk.bf16.vlgmr.msra.gmra.mxu3 %vm278_vm1, %v550_v9 }
  0x9a   : > { %v304_v10 = vpop.f32.mrf.mxu0  ;;  %v309_v11 = vpop.f32.mrf.mxu1 }
  0x9b   : > { %v353_v14 = vmul.f32 %v304_v10, %v304_v10  ;;  %v355_v21 = vmul.f32 %v309_v11, %v309_v11 }
  0xa1   : > { %v314_v12 = vpop.f32.mrf.mxu2  ;;  %v319_v13 = vpop.f32.mrf.mxu3 }
  0xa2   : > { %v306_v15 = vpop.f32.mrf.mxu0  ;;  %v311_v16 = vpop.f32.mrf.mxu1  ;;  %v357_v27 = vmul.f32 %v314_v12, %v314_v12  ;;  %v359_v37 = vmul.f32 %v319_v13, %v319_v13 }
  0xa3   : > { %v556_v17 = vpack.c.bf16 %v306_v15, %v304_v10  ;;  %v340_v18 = vadd.f32 %v306_v15, %v304_v10  ;;  %v354_v19 = vmul.f32 %v306_v15, %v306_v15  ;;  %v561_v20 = vpack.c.bf16 %v311_v16, %v309_v11 }
  0xa4   : > { %v356_v25 = vmul.f32 %v311_v16, %v311_v16 }
  0xa5   : > { %557 = vst [vmem:[%s220_s28] sm:$0xff] %v556_v17   ;;  %v361_v22 = vadd.f32 %v354_v19, %v353_v14  ;;  %v341_v23 = vadd.f32 %v340_v18, %v309_v11 }
  0xa6   : > { %573 = vst [vmem:[%s220_s28 + $0x8] sm:$0xff] %v561_v20  }
  0xa7   : > { %v342_v24 = vadd.f32 %v341_v23, %v311_v16  ;;  %v362_v26 = vadd.f32 %v361_v22, %v355_v21 }
  0xa9   : > { %v363_v28 = vadd.f32 %v362_v26, %v356_v25  ;;  %v316_v29 = vpop.f32.mrf.mxu2  ;;  %v343_v30 = vadd.f32 %v342_v24, %v314_v12  ;;  %v321_v31 = vpop.f32.mrf.mxu3 }
  0xaa   : > { %v566_v32 = vpack.c.bf16 %v316_v29, %v314_v12  ;;  %v571_v33 = vpack.c.bf16 %v321_v31, %v319_v13  ;;  %v358_v35 = vmul.f32 %v316_v29, %v316_v29  ;;  %v360_v41 = vmul.f32 %v321_v31, %v321_v31 }
  0xab   : > { %v344_v34 = vadd.f32 %v343_v30, %v316_v29  ;;  %v364_v36 = vadd.f32 %v363_v28, %v357_v27 }
  0xac   : > { %574 = vst [vmem:[%s220_s28 + $0x10] sm:$0xff] %v566_v32  }
  0xad   : > { %v365_v38 = vadd.f32 %v364_v36, %v358_v35  ;;  %575 = vst [vmem:[%s220_s28 + $0x18] sm:$0xff] %v571_v33   ;;  %v345_v39 = vadd.f32 %v344_v34, %v319_v13 }
  0xaf   : > { %v346_v40 = vadd.f32 %v345_v39, %v321_v31  ;;  %v366_v42 = vadd.f32 %v365_v38, %v359_v37 }
  0xb1   : > { %v347_v43 = vrot.slane %v346_v40, 4  ;;  %v367_v44 = vadd.f32 %v366_v42, %v360_v41 }
  0xb3   : > { %v348_v45 = vadd.f32 %v347_v43, %v346_v40  ;;  %v368_v46 = vrot.slane %v367_v44, 4 }
  0xb5   : > { %v349_v47 = vrot.slane %v348_v45, 2  ;;  %v369_v48 = vadd.f32 %v368_v46, %v367_v44 }
  0xb7   : > { %v350_v49 = vadd.f32 %v349_v47, %v348_v45  ;;  %v370_v50 = vrot.slane %v369_v48, 2 }
  0xb9   : > { %v351_v51 = vrot.slane %v350_v49, 1  ;;  %v371_v52 = vadd.f32 %v370_v50, %v369_v48 }
  0xbb   : > { %v372_v53 = vrot.slane %v371_v52, 1  ;;  %v352_v54 = vadd.f32 %v351_v51, %v350_v49 }
  0xbd   : > { %v373_v55 = vadd.f32 %v372_v53, %v371_v52 }
  0xbf   : > { %v375_v56 = vsel %vm374_vm2, %v352_v54, %v373_v55 }
  0xc0   : > { %376 = vst [vmem:[%s228_s5] sm:$0x3] %v375_v56 }
  0xc1 PF: > { %s14_s14 = sadd.s32 1, %s631_s14   ;;  %s706_s12 = smov %s627_s13 }
  0xc2   : > { %p11_p5 = scmp.ge.s32.totalorder %s14_s14, 4   ;;  %s707_s13 = smov %s709_s15 }
  0xc4   :  { %13 = sbr.rel (!%p11_p5) target bundleno = 2 (0x2), region = 70 }

// kernel: basic_block_arm_forward.8
= control target key start
LH: loop header
LB: loop body
LE: loop exit
PB: predicated region body
PF: predicated region fallthrough
CT: control target
= control target key end

     0   :  { %s1011_s12 = smov 0   ;;  %s1013_s13 = smov 0   ;;  %s1146_s0 = inlined_call_operand.vmem [shape: bf16[2,64,288], index: 0, kind: input, shape index: {}]   ;;  %s1147_s1 = inlined_call_operand.vmem [shape: bf16[288,128], index: 1, kind: input, shape index: {}]   ;;  %s1148_s2 = inlined_call_operand.vmem [shape: bf16[2,64,128], index: 2, kind: output, shape index: {0}]   ;;  %s1149_s3 = inlined_call_operand.vmem [shape: f32[2,1,2,128], index: 3, kind: output, shape index: {1}]  }
   0x1   :  { %s1015_s14 = smov 0  }
   0x2 LB: > { %s26_s15 = sadd.s32 1, %s985_s13  ;;  %p741_p0 = scmp.ge.s32.totalorder %s989_s14, 1  ;;  %s989_s14 = sphi %s1015_s14, %s14_s14   ;;  %s985_s13 = sphi %s1013_s13, %s1151_s13   ;;  %s981_s12 = sphi %s1011_s12, %s1150_s12  }
   0x3   : > { %p28_p1 = scmp.ge.s32.totalorder %s26_s15, 2  ;;  %p164_p2 = scmp.lt.s32.totalorder %s989_s14, 3 }
   0x5   : > { %s1153_s15 = smov (%p28_p1, %s26_s15), 0  ;;  %p165_p3 = pnand %p741_p0, %p164_p2 }
   0x6   : > { %p205_p4 = scmp.lt.s32.totalorder (!%p165_p3), %s981_s12, 1 }
   0x7   : > { %168 = sbr.rel (%p165_p3) target bundleno = 244 (0xf4), region = 28 }
   0xc   : > { %v892_v0 = vld [vmem:[%s1147_s1 + $0x38] sm:$0xff]  ;;  %v902_v2 = vld [vmem:[%s1147_s1 + $0x88] sm:$0xff]  ;;  %v891_v3 = vld [vmem:[%s1147_s1 + $0x30] sm:$0xff]  ;;  %s1155_s12 = smov (!%p205_p4, %s981_s12), 1  ;;  %vm453_vm0 = vcmask 261120   ;;  %vm603_vm1 = vcmask 1040384  }
   0xd   : > { %v1035_v1 = vld [vmem:[%s1147_s1 + $0x78] sm:$0xff]  ;;  %466 = vmatpush.bf16.msra.mxu0 %v892_v0  ;;  %926 = vmatpush.bf16.msra.mxu3 %v892_v0  ;;  %v899_v4 = vld [vmem:[%s1147_s1 + $0x70] sm:$0xff]  ;;  %v901_v5 = vld [vmem:[%s1147_s1 + $0x80] sm:$0xff]  ;;  %s942_s28 = smul.u32 96, %s1155_s12  ;;  %s872_s7 = sshll.u32 %s1155_s12, 5 }
   0xe   : > { %934 = vmatpush.bf16.msra.mxu1 %v1035_v1  ;;  %530 = vmatpush.bf16.msra.mxu2 %v902_v2  ;;  %v890_v6 = vld [vmem:[%s1147_s1 + $0x28] sm:$0xff]  ;;  %v889_v11 = vld [vmem:[%s1147_s1 + $0x20] sm:$0xff]  ;;  %v888_v13 = vld [vmem:[%s1147_s1 + $0x18] sm:$0xff]  ;;  %s1127_s9 = scalar_lea.vmem %s1148_s2, %s872_s7  ;;  %s745_s10 = sshll.u32 %s1155_s12, 1 }
   0xf   : > { %s1059_s6 = scalar_lea.vmem %s1146_s0, %s942_s28  ;;  %v898_v7 = vld [vmem:[%s1147_s1 + $0x68] sm:$0xff]  ;;  %v897_v12 = vld [vmem:[%s1147_s1 + $0x60] sm:$0xff]  ;;  %v896_v14 = vld [vmem:[%s1147_s1 + $0x58] sm:$0xff]  ;;  %s231_s17 = scalar_lea.vmem %s1149_s3, %s745_s10 }
  0x10   : > { %v756_v8 = vld [vmem:[%s1059_s6 + $0x8] sm:$0xf]  ;;  %v875_v9 = vld [vmem:[%s1059_s6 + $0x10] sm:$0xf0]  ;;  %v768_v17 = vld [vmem:[%s1059_s6 + $0x20] sm:$0xf] }
  0x11   : > { %467 = vmatpush.bf16.msra.mxu0 %v891_v3  ;;  %927 = vmatpush.bf16.msra.mxu3 %v891_v3  ;;  %v757_v10 = vor.u32 %v875_v9, %v756_v8  ;;  %v887_v15 = vld [vmem:[%s1147_s1 + $0x10] sm:$0xff]  ;;  %v878_v18 = vld [vmem:[%s1059_s6 + $0x28] sm:$0xf0]  ;;  %v885_v22 = vld [vmem:[%s1147_s1] sm:$0xff] }
  0x12   : > { %935 = vmatpush.bf16.msra.mxu1 %v899_v4  ;;  %531 = vmatpush.bf16.msra.mxu2 %v901_v5  ;;  %v895_v16 = vld [vmem:[%s1147_s1 + $0x50] sm:$0xff]  ;;  %v886_v19 = vld [vmem:[%s1147_s1 + $0x8] sm:$0xff]  ;;  %v769_v21 = vor.u32 %v878_v18, %v768_v17  ;;  %v760_v23 = vld [vmem:[%s1059_s6 + $0x18] sm:$0xf] }
  0x13   : > { %v894_v20 = vld [vmem:[%s1147_s1 + $0x48] sm:$0xff]  ;;  %v877_v24 = vld [vmem:[%s1059_s6 + $0x20] sm:$0xf0]  ;;  %v748_v25 = vld [vmem:[%s1059_s6] sm:$0xf] }
  0x14   : > { %v874_v26 = vld [vmem:[%s1059_s6 + $0x8] sm:$0xf0]  ;;  %v893_v27 = vld [vmem:[%s1147_s1 + $0x40] sm:$0xff]  ;;  %v876_v28 = vld [vmem:[%s1059_s6 + $0x1c] sm:$0xf]  ;;  %v761_v30 = vor.u32 %v877_v24, %v760_v23 }
  0x15   : > { %468 = vmatpush.bf16.msra.mxu0 %v890_v6  ;;  %928 = vmatpush.bf16.msra.mxu3 %v890_v6  ;;  %v762_v29 = vld [vmem:[%s1059_s6 + $0x24] sm:$0xf0]  ;;  %v749_v31 = vor.u32 %v874_v26, %v748_v25  ;;  %v780_v33 = vld [vmem:[%s1059_s6 + $0x38] sm:$0xf]  ;;  %v881_v34 = vld [vmem:[%s1059_s6 + $0x40] sm:$0xf0] }
  0x16   : > { %936 = vmatpush.bf16.msra.mxu1 %v898_v7  ;;  %866 = vmatmul.msk.bf16.vlgmr.msra.gmra.mxu2 %vm453_vm0, %v757_v10  ;;  %v765_v32 = vor.u32 %v876_v28, %v762_v29  ;;  %v781_v35 = vor.u32 %v881_v34, %v780_v33  ;;  %v772_v36 = vld [vmem:[%s1059_s6 + $0x30] sm:$0xf]  ;;  %v880_v37 = vld [vmem:[%s1059_s6 + $0x38] sm:$0xf0]  ;;  %v879_v38 = vld [vmem:[%s1059_s6 + $0x34] sm:$0xf] }
  0x17   : > { %v774_v39 = vld [vmem:[%s1059_s6 + $0x3c] sm:$0xf0]  ;;  %v773_v40 = vor.u32 %v880_v37, %v772_v36  ;;  %v792_v42 = vld [vmem:[%s1059_s6 + $0x50] sm:$0xf]  ;;  %v884_v43 = vld [vmem:[%s1059_s6 + $0x58] sm:$0xf0] }
  0x18   : > { %v777_v41 = vor.u32 %v879_v38, %v774_v39  ;;  %v873_v44 = vld [vmem:[%s1059_s6 + $0x4] sm:$0xf]  ;;  %v750_v45 = vld [vmem:[%s1059_s6 + $0xc] sm:$0xf0]  ;;  %v793_v46 = vor.u32 %v884_v43, %v792_v42  ;;  %v784_v48 = vld [vmem:[%s1059_s6 + $0x48] sm:$0xf] }
  0x19   : > { %469 = vmatpush.bf16.msra.mxu0 %v889_v11  ;;  %929 = vmatpush.bf16.msra.mxu3 %v889_v11  ;;  %v753_v47 = vor.u32 %v873_v44, %v750_v45  ;;  %v883_v49 = vld [vmem:[%s1059_s6 + $0x50] sm:$0xf0]  ;;  %v882_v50 = vld [vmem:[%s1059_s6 + $0x4c] sm:$0xf]  ;;  %v786_v51 = vld [vmem:[%s1059_s6 + $0x54] sm:$0xf0] }
  0x1a   : > { %937 = vmatpush.bf16.msra.mxu1 %v897_v12  ;;  %v785_v52 = vor.u32 %v883_v49, %v784_v48  ;;  %v789_v53 = vor.u32 %v882_v50, %v786_v51 }
  0x1d   : > { %470 = vmatpush.bf16.msra.mxu0 %v888_v13  ;;  %930 = vmatpush.bf16.msra.mxu3 %v888_v13 }
  0x1e   : > { %938 = vmatpush.bf16.msra.mxu1 %v896_v14 }
  0x21   : > { %471 = vmatpush.bf16.msra.mxu0 %v887_v15  ;;  %931 = vmatpush.bf16.msra.mxu3 %v887_v15 }
  0x22   : > { %939 = vmatpush.bf16.msra.mxu1 %v895_v16 }
  0x25   : > { %472 = vmatpush.bf16.msra.mxu0 %v886_v19  ;;  %932 = vmatpush.bf16.msra.mxu3 %v886_v19 }
  0x26   : > { %940 = vmatpush.bf16.msra.mxu1 %v894_v20  ;;  %867 = vmatmul.msk.bf16.gmra.mxu2 %vm453_vm0, %v769_v21 }
  0x29   : > { %473 = vmatpush.bf16.msra.mxu0 %v885_v22  ;;  %933 = vmatpush.bf16.msra.mxu3 %v885_v22 }
  0x2a   : > { %941 = vmatpush.bf16.msra.mxu1 %v893_v27 }
  0x2c   : > { %479 = vmatmul.bf16.vlgmr.msra.gmra.mxu3 %v761_v30  ;;  %474 = vmatmul.bf16.vlgmr.msra.gmra.mxu0 %v749_v31 }
  0x2d   : > { %495 = vmatpush.bf16.msrb.mxu0 %v1035_v1  ;;  %508 = vmatmul.bf16.vlgmr.msra.gmra.mxu1 %v765_v32 }
  0x31   : > { %496 = vmatpush.bf16.msrb.mxu0 %v899_v4 }
  0x35   : > { %497 = vmatpush.bf16.msrb.mxu0 %v898_v7 }
  0x36   : > { %868 = vmatmul.msk.bf16.gmra.mxu2 %vm453_vm0, %v781_v35 }
  0x39   : > { %498 = vmatpush.bf16.msrb.mxu0 %v897_v12 }
  0x3c   : > { %484 = vmatmul.bf16.gmra.mxu3 %v773_v40 }
  0x3d   : > { %499 = vmatpush.bf16.msrb.mxu0 %v896_v14  ;;  %513 = vmatmul.bf16.gmra.mxu1 %v777_v41 }
  0x41   : > { %500 = vmatpush.bf16.msrb.mxu0 %v895_v16 }
  0x45   : > { %501 = vmatpush.bf16.msrb.mxu0 %v894_v20 }
  0x46   : > { %869 = vmatmul.msk.bf16.gmra.mxu2 %vm453_vm0, %v793_v46 }
  0x49   : > { %502 = vmatpush.bf16.msrb.mxu0 %v893_v27 }
  0x4c   : > { %503 = vmatmul.bf16.vlgmr.msrb.gmra.mxu0 %v753_v47  ;;  %489 = vmatmul.bf16.gmra.mxu3 %v785_v52 }
  0x4d   : > { %518 = vmatmul.bf16.gmra.mxu1 %v789_v53 }
  0x99   : > { %v533_v54 = vpop.f32.mrf.mxu2 }
  0xa1   : > { %v535_v55 = vpop.f32.mrf.mxu2 }
  0xa9   : > { %v538_v56 = vpop.f32.mrf.mxu2  ;;  %v475_v61 = vpop.f32.mrf.mxu0 }
  0xaa   : > { %v509_v57 = vpop.f32.mrf.mxu1 }
  0xaf   : > { %v480_v58 = vpop.f32.mrf.mxu3 }
  0xb0   : > { %v510_v62 = vadd.f32 %v509_v57, %v480_v58 }
  0xb1   : > { %v540_v59 = vpop.f32.mrf.mxu2  ;;  %v477_v6 = vpop.f32.mrf.mxu0 }
  0xb2   : > { %v511_v60 = vpop.f32.mrf.mxu1  ;;  %v539_v1 = vadd.f32 %v538_v56, %v510_v62 }
  0xb4   : > { %v584_v29 = vmul.f32 %v539_v1, %v539_v1 }
  0xb7   : > { %v482_v63 = vpop.f32.mrf.mxu3 }
  0xb8   : > { %v512_v0 = vadd.f32 %v511_v60, %v482_v63 }
  0xb9   : > { %v543_v4 = vpop.f32.mrf.mxu2 }
  0xba   : > { %v541_v2 = vadd.f32 %v540_v59, %v512_v0  ;;  %v514_v3 = vpop.f32.mrf.mxu1 }
  0xbc   : > { %v911_v5 = vpack.c.bf16 %v541_v2, %v539_v1  ;;  %v585_v33 = vmul.f32 %v541_v2, %v541_v2 }
  0xbe   : > { %923 = vst [vmem:[%s1127_s9 + $0x8] sm:$0xff] %v911_v5  }
  0xbf   : > { %v485_v7 = vpop.f32.mrf.mxu3 }
  0xc0   : > { %v515_v10 = vadd.f32 %v514_v3, %v485_v7 }
  0xc1   : > { %v545_v9 = vpop.f32.mrf.mxu2 }
  0xc2   : > { %v516_v8 = vpop.f32.mrf.mxu1  ;;  %v544_v14 = vadd.f32 %v543_v4, %v515_v10 }
  0xc4   : > { %v586_v39 = vmul.f32 %v544_v14, %v544_v14 }
  0xc7   : > { %v487_v12 = vpop.f32.mrf.mxu3 }
  0xc8   : > { %v517_v13 = vadd.f32 %v516_v8, %v487_v12 }
  0xc9   : > { %v504_v11 = vpop.f32.mrf.mxu0  ;;  %v548_v21 = vpop.f32.mrf.mxu2 }
  0xca   : > { %v546_v15 = vadd.f32 %v545_v9, %v517_v13  ;;  %v505_v16 = vadd.f32 %v504_v11, %v475_v61  ;;  %v519_v18 = vpop.f32.mrf.mxu1 }
  0xcc   : > { %v916_v17 = vpack.c.bf16 %v546_v15, %v544_v14  ;;  %v534_v20 = vadd.f32 %v533_v54, %v505_v16  ;;  %v587_v45 = vmul.f32 %v546_v15, %v546_v15 }
  0xce   : > { %924 = vst [vmem:[%s1127_s9 + $0x10] sm:$0xff] %v916_v17   ;;  %v582_v25 = vmul.f32 %v534_v20, %v534_v20 }
  0xcf   : > { %v490_v23 = vpop.f32.mrf.mxu3 }
  0xd0   : > { %v520_v32 = vadd.f32 %v519_v18, %v490_v23 }
  0xd1   : > { %v506_v19 = vpop.f32.mrf.mxu0  ;;  %v550_v43 = vpop.f32.mrf.mxu2 }
  0xd2   : > { %v507_v22 = vadd.f32 %v506_v19, %v477_v6  ;;  %v521_v36 = vpop.f32.mrf.mxu1  ;;  %v549_v41 = vadd.f32 %v548_v21, %v520_v32 }
  0xd4   : > { %v536_v24 = vadd.f32 %v535_v55, %v507_v22  ;;  %v588_v50 = vmul.f32 %v549_v41, %v549_v41 }
  0xd6   : > { %v906_v26 = vpack.c.bf16 %v536_v24, %v534_v20  ;;  %v569_v27 = vadd.f32 %v536_v24, %v534_v20  ;;  %v583_v28 = vmul.f32 %v536_v24, %v536_v24 }
  0xd7   : > { %v492_v37 = vpop.f32.mrf.mxu3 }
  0xd8   : > { %907 = vst [vmem:[%s1127_s9] sm:$0xff] %v906_v26   ;;  %v570_v30 = vadd.f32 %v569_v27, %v539_v1  ;;  %v590_v31 = vadd.f32 %v583_v28, %v582_v25  ;;  %v522_v38 = vadd.f32 %v521_v36, %v492_v37 }
  0xda   : > { %v571_v34 = vadd.f32 %v570_v30, %v541_v2  ;;  %v591_v35 = vadd.f32 %v590_v31, %v584_v29  ;;  %v551_v44 = vadd.f32 %v550_v43, %v522_v38 }
  0xdc   : > { %v592_v40 = vadd.f32 %v591_v35, %v585_v33  ;;  %v572_v42 = vadd.f32 %v571_v34, %v544_v14  ;;  %v921_v48 = vpack.c.bf16 %v551_v44, %v549_v41  ;;  %v589_v54 = vmul.f32 %v551_v44, %v551_v44 }
  0xde   : > { %v573_v46 = vadd.f32 %v572_v42, %v546_v15  ;;  %v593_v47 = vadd.f32 %v592_v40, %v586_v39  ;;  %925 = vst [vmem:[%s1127_s9 + $0x18] sm:$0xff] %v921_v48  }
  0xe0   : > { %v574_v49 = vadd.f32 %v573_v46, %v549_v41  ;;  %v594_v51 = vadd.f32 %v593_v47, %v587_v45 }
  0xe2   : > { %v595_v52 = vadd.f32 %v594_v51, %v588_v50  ;;  %v575_v53 = vadd.f32 %v574_v49, %v551_v44 }
  0xe4   : > { %v576_v55 = vrot.slane %v575_v53, 4  ;;  %v596_v56 = vadd.f32 %v595_v52, %v589_v54 }
  0xe6   : > { %v577_v57 = vadd.f32 %v576_v55, %v575_v53  ;;  %v597_v58 = vrot.slane %v596_v56, 4 }
  0xe8   : > { %v578_v59 = vrot.slane %v577_v57, 2  ;;  %v598_v60 = vadd.f32 %v597_v58, %v596_v56 }
  0xea   : > { %v579_v61 = vadd.f32 %v578_v59, %v577_v57  ;;  %v599_v62 = vrot.slane %v598_v60, 2 }
  0xec   : > { %v580_v63 = vrot.slane %v579_v61, 1  ;;  %v600_v0 = vadd.f32 %v599_v62, %v598_v60 }
  0xee   : > { %v601_v1 = vrot.slane %v600_v0, 1  ;;  %v581_v2 = vadd.f32 %v580_v63, %v579_v61 }
  0xf0   : > { %v602_v3 = vadd.f32 %v601_v1, %v600_v0 }
  0xf2   : > { %v604_v4 = vsel %vm603_vm1, %v581_v2, %v602_v3 }
  0xf3   : > { %605 = vst [vmem:[%s231_s17] sm:$0x3] %v604_v4 }
  0xf4 PF: > { %s14_s14 = sadd.s32 1, %s989_s14   ;;  %s1150_s12 = smov %s985_s13 }
  0xf5   : > { %p11_p5 = scmp.ge.s32.totalorder %s14_s14, 4   ;;  %s1151_s13 = smov %s1153_s15 }
  0xf7   :  { %13 = sbr.rel (!%p11_p5) target bundleno = 2 (0x2), region = 70 }

// kernel: basic_block_arm_forward.9
= control target key start
LH: loop header
LB: loop body
LE: loop exit
PB: predicated region body
PF: predicated region fallthrough
CT: control target
= control target key end

     0   :  { %vm57_vm0 = vcmask 1041408   ;;  %vm53_vm1 = vcmask 15360   ;;  %s188_s1 = inlined_call_operand.vmem [shape: f32[128,2], index: 1, kind: input, shape index: {}]   ;;  %s189_s0 = inlined_call_operand.vmem [shape: f32[2,128], index: 0, kind: input, shape index: {}]   ;;  %s190_s2 = inlined_call_operand.vmem [shape: f32[2,128], index: 2, kind: input, shape index: {}]   ;;  %s191_s3 = inlined_call_operand.vmem [shape: f32[2,128], index: 3, kind: output, shape index: {}]  }
   0x1   :  { %v30_v0 = vld [vmem:[%s188_s1 + $0x78] sm:$0xff]  ;;  %v29_v1 = vld [vmem:[%s188_s1 + $0x70] sm:$0xff]  ;;  %v28_v2 = vld [vmem:[%s188_s1 + $0x68] sm:$0xff] }
   0x2   :  { %31 = vmatpush.msra.mxu0 %v30_v0  ;;  %v27_v3 = vld [vmem:[%s188_s1 + $0x60] sm:$0xff]  ;;  %v26_v4 = vld [vmem:[%s188_s1 + $0x58] sm:$0xff]  ;;  %v25_v5 = vld [vmem:[%s188_s1 + $0x50] sm:$0xff] }
   0x3   :  { %v24_v6 = vld [vmem:[%s188_s1 + $0x48] sm:$0xff]  ;;  %v23_v7 = vld [vmem:[%s188_s1 + $0x40] sm:$0xff]  ;;  %v22_v8 = vld [vmem:[%s188_s1 + $0x38] sm:$0xff] }
   0x4   :  { %32 = vmatpush.msra.mxu0 %v29_v1  ;;  %v21_v9 = vld [vmem:[%s188_s1 + $0x30] sm:$0xff]  ;;  %v20_v10 = vld [vmem:[%s188_s1 + $0x28] sm:$0xff]  ;;  %v19_v11 = vld [vmem:[%s188_s1 + $0x20] sm:$0xff] }
   0x5   :  { %v18_v12 = vld [vmem:[%s188_s1 + $0x18] sm:$0xff]  ;;  %v17_v13 = vld [vmem:[%s188_s1 + $0x10] sm:$0xff]  ;;  %v16_v14 = vld [vmem:[%s188_s1 + $0x8] sm:$0xff] }
   0x6   :  { %33 = vmatpush.msra.mxu0 %v28_v2  ;;  %v15_v15 = vld [vmem:[%s188_s1] sm:$0xff] }
   0x7   :  { %v14_v16 = vld [vmem:[%s189_s0] sm:$0x3] }
   0x8   :  { %34 = vmatpush.msra.mxu0 %v27_v3  ;;  %v52_v17 = vld [vmem:[%s190_s2] sm:$0x3] }
   0x9   :  { %105 = vmatpush.msk.msra.mxu1 %vm57_vm0, %v52_v17 }
   0xa   :  { %35 = vmatpush.msra.mxu0 %v26_v4 }
   0xc   :  { %36 = vmatpush.msra.mxu0 %v25_v5 }
   0xe   :  { %37 = vmatpush.msra.mxu0 %v24_v6 }
  0x10   :  { %38 = vmatpush.msra.mxu0 %v23_v7 }
  0x12   :  { %39 = vmatpush.msra.mxu0 %v22_v8 }
  0x14   :  { %40 = vmatpush.msra.mxu0 %v21_v9 }
  0x16   :  { %41 = vmatpush.msra.mxu0 %v20_v10 }
  0x18   :  { %42 = vmatpush.msra.mxu0 %v19_v11 }
  0x1a   :  { %43 = vmatpush.msra.mxu0 %v18_v12 }
  0x1c   :  { %44 = vmatpush.msra.mxu0 %v17_v13 }
  0x1e   :  { %45 = vmatpush.msra.mxu0 %v16_v14 }
  0x20   :  { %46 = vmatpush.msra.mxu0 %v15_v15 }
  0x21   :  { %47 = vmatmul.f32.vlgmr.msra.gmra.mxu0 %v14_v16 }
  0x9e   :  { %v48_v18 = vpop.f32.mrf.mxu0 }
  0x9f   :  { %v51_v19 = vmax.f32 %v48_v18, 0.0 }
  0xa1   :  { %106 = vmatmul.msk.f32.vlgmr.msra.gmra.mxu1 %vm53_vm1, %v51_v19 }
 0x11e   :  { %v78_v20 = vpop.f32.mrf.mxu1 }
 0x11f   :  { %v81_v21 = vsub.f32 0.0, %v78_v20 }
 0x121   :  { %v82_v22 = vmul.f32 1.442695, %v81_v21 }
 0x123   :  { %107 = vpow2.f32 %v82_v22 }
 0x129   :  { %v108_v23 = vpop.eup %107 }
 0x12a   :  { %v84_v24 = vadd.f32 1.0, %v108_v23 }
 0x12c   :  { %109 = vrcp.f32 %v84_v24  ;;  %v96_v28 = vand.u32 2147483648, %v84_v24  ;;  %v94_v30 = vand.u32 2147483647, %v84_v24  ;;  %vm90_vm3 = vweird.f32 %v84_v24 }
 0x12e   :  { %v97_v32 = vor.u32 1.1754944e-38, %v96_v28  ;;  %vm95_vm5 = vcmp.eq.f32.partialorder %v94_v30, 8.507059e+37 }
 0x132   :  { %v110_v25 = vpop.eup %109 }
 0x133   :  { %v86_v26 = vmul.f32 %v110_v25, %v84_v24  ;;  %vm91_vm2 = vweird.f32 %v110_v25 }
 0x134   :  { %vm92_vm4 = vmor %vm90_vm3, %vm91_vm2 }
 0x135   :  { %v87_v27 = vsub.f32 1.0, %v86_v26 }
 0x137   :  { %v88_v29 = vmul.f32 %v110_v25, %v87_v27 }
 0x139   :  { %v89_v31 = vadd.f32 %v110_v25, %v88_v29 }
 0x13b   :  { %v93_v33 = vsel %vm92_vm4, %v110_v25, %v89_v31 }
 0x13c   :  { %v98_v34 = vsel %vm95_vm5, %v97_v32, %v93_v33 }
 0x13d   :  { %100 = vst [vmem:[%s191_s3] sm:$0x3] %v98_v34 }

// kernel: basic_block_arm_forward.10
= control target key start
LH: loop header
LB: loop body
LE: loop exit
PB: predicated region body
PF: predicated region fallthrough
CT: control target
= control target key end

     0   :  { %s618_s12 = smov 0   ;;  %s620_s13 = smov 0   ;;  %s661_s0 = inlined_call_operand.vmem [shape: bf16[2,64,4], index: 0, kind: input, shape index: {}]   ;;  %s662_s1 = inlined_call_operand.vmem [shape: bf16[4,128], index: 1, kind: input, shape index: {}]   ;;  %s663_s2 = inlined_call_operand.vmem [shape: bf16[2,64,128], index: 2, kind: output, shape index: {0}]   ;;  %s664_s3 = inlined_call_operand.vmem [shape: f32[2,1,2,128], index: 3, kind: output, shape index: {1}]  }
   0x1   :  { %s622_s14 = smov 0  }
   0x2 LB: > { %s26_s15 = sadd.s32 1, %s592_s13  ;;  %p490_p0 = scmp.ge.s32.totalorder %s596_s14, 1  ;;  %s596_s14 = sphi %s622_s14, %s14_s14   ;;  %s592_s13 = sphi %s620_s13, %s666_s13   ;;  %s588_s12 = sphi %s618_s12, %s665_s12  }
   0x3   : > { %p28_p1 = scmp.ge.s32.totalorder %s26_s15, 2  ;;  %p163_p2 = scmp.lt.s32.totalorder %s596_s14, 3 }
   0x5   : > { %s668_s15 = smov (%p28_p1, %s26_s15), 0  ;;  %p164_p3 = pnand %p490_p0, %p163_p2 }
   0x6   : > { %p203_p4 = scmp.lt.s32.totalorder (!%p164_p3), %s588_s12, 1 }
   0x7   : > { %167 = sbr.rel (%p164_p3) target bundleno = 181 (0xb5), region = 28 }
   0xc   : > { %v238_v0 = vld [vmem:[%s662_s1] sm:$0x3]  ;;  %vm272_vm0 = vcmask 1041408   ;;  %s670_s12 = smov (!%p203_p4, %s588_s12), 1  ;;  %vm259_vm1 = vcmask 31744   ;;  %vm355_vm2 = vcmask 1040384  }
   0xd   : > { %v274_v1 = vsel %vm272_vm0, %v238_v0, 0  ;;  %s518_s18 = sshll.u32 %s670_s12, 5  ;;  %s495_s25 = sshll.u32 %s670_s12, 1 }
   0xe   : > { %283 = vmatpush.bf16.msra.mxu0 %v274_v1  ;;  %547 = vmatpush.bf16.msra.mxu1 %v274_v1  ;;  %s210_s21 = scalar_lea.vmem %s661_s0, %s518_s18  ;;  %s220_s24 = scalar_lea.vmem %s663_s2, %s518_s18 }
   0xf   : > { %548 = vmatpush.bf16.msra.mxu2 %v274_v1  ;;  %549 = vmatpush.bf16.msra.mxu3 %v274_v1  ;;  %v520_v2 = vld [vmem:[%s210_s21] sm:$0xff]  ;;  %v521_v3 = vld [vmem:[%s210_s21 + $0x8] sm:$0xff]  ;;  %v522_v4 = vld [vmem:[%s210_s21 + $0x10] sm:$0xff]  ;;  %s228_s28 = scalar_lea.vmem %s664_s3, %s495_s25 }
  0x10   : > { %v523_v5 = vld [vmem:[%s210_s21 + $0x18] sm:$0xff] }
  0x11   : > { %512 = vmatmul.msk.bf16.vlgmr.msra.gmra.mxu0 %vm259_vm1, %v520_v2  ;;  %513 = vmatmul.msk.bf16.vlgmr.msra.gmra.mxu1 %vm259_vm1, %v521_v3 }
  0x12   : > { %514 = vmatmul.msk.bf16.vlgmr.msra.gmra.mxu2 %vm259_vm1, %v522_v4  ;;  %515 = vmatmul.msk.bf16.vlgmr.msra.gmra.mxu3 %vm259_vm1, %v523_v5 }
  0x8e   : > { %v285_v6 = vpop.f32.mrf.mxu0  ;;  %v290_v7 = vpop.f32.mrf.mxu1 }
  0x8f   : > { %v334_v10 = vmul.f32 %v285_v6, %v285_v6  ;;  %v336_v17 = vmul.f32 %v290_v7, %v290_v7 }
  0x95   : > { %v295_v8 = vpop.f32.mrf.mxu2  ;;  %v300_v9 = vpop.f32.mrf.mxu3 }
  0x96   : > { %v287_v11 = vpop.f32.mrf.mxu0  ;;  %v292_v12 = vpop.f32.mrf.mxu1  ;;  %v338_v23 = vmul.f32 %v295_v8, %v295_v8  ;;  %v340_v33 = vmul.f32 %v300_v9, %v300_v9 }
  0x97   : > { %v527_v13 = vpack.c.bf16 %v287_v11, %v285_v6  ;;  %v321_v14 = vadd.f32 %v287_v11, %v285_v6  ;;  %v335_v15 = vmul.f32 %v287_v11, %v287_v11  ;;  %v532_v16 = vpack.c.bf16 %v292_v12, %v290_v7 }
  0x98   : > { %v337_v21 = vmul.f32 %v292_v12, %v292_v12 }
  0x99   : > { %528 = vst [vmem:[%s220_s24] sm:$0xff] %v527_v13   ;;  %v342_v18 = vadd.f32 %v335_v15, %v334_v10  ;;  %v322_v19 = vadd.f32 %v321_v14, %v290_v7 }
  0x9a   : > { %544 = vst [vmem:[%s220_s24 + $0x8] sm:$0xff] %v532_v16  }
  0x9b   : > { %v323_v20 = vadd.f32 %v322_v19, %v292_v12  ;;  %v343_v22 = vadd.f32 %v342_v18, %v336_v17 }
  0x9d   : > { %v344_v24 = vadd.f32 %v343_v22, %v337_v21  ;;  %v297_v25 = vpop.f32.mrf.mxu2  ;;  %v324_v26 = vadd.f32 %v323_v20, %v295_v8  ;;  %v302_v27 = vpop.f32.mrf.mxu3 }
  0x9e   : > { %v537_v28 = vpack.c.bf16 %v297_v25, %v295_v8  ;;  %v542_v29 = vpack.c.bf16 %v302_v27, %v300_v9  ;;  %v339_v31 = vmul.f32 %v297_v25, %v297_v25  ;;  %v341_v37 = vmul.f32 %v302_v27, %v302_v27 }
  0x9f   : > { %v325_v30 = vadd.f32 %v324_v26, %v297_v25  ;;  %v345_v32 = vadd.f32 %v344_v24, %v338_v23 }
  0xa0   : > { %545 = vst [vmem:[%s220_s24 + $0x10] sm:$0xff] %v537_v28  }
  0xa1   : > { %v346_v34 = vadd.f32 %v345_v32, %v339_v31  ;;  %546 = vst [vmem:[%s220_s24 + $0x18] sm:$0xff] %v542_v29   ;;  %v326_v35 = vadd.f32 %v325_v30, %v300_v9 }
  0xa3   : > { %v327_v36 = vadd.f32 %v326_v35, %v302_v27  ;;  %v347_v38 = vadd.f32 %v346_v34, %v340_v33 }
  0xa5   : > { %v328_v39 = vrot.slane %v327_v36, 4  ;;  %v348_v40 = vadd.f32 %v347_v38, %v341_v37 }
  0xa7   : > { %v329_v41 = vadd.f32 %v328_v39, %v327_v36  ;;  %v349_v42 = vrot.slane %v348_v40, 4 }
  0xa9   : > { %v330_v43 = vrot.slane %v329_v41, 2  ;;  %v350_v44 = vadd.f32 %v349_v42, %v348_v40 }
  0xab   : > { %v331_v45 = vadd.f32 %v330_v43, %v329_v41  ;;  %v351_v46 = vrot.slane %v350_v44, 2 }
  0xad   : > { %v332_v47 = vrot.slane %v331_v45, 1  ;;  %v352_v48 = vadd.f32 %v351_v46, %v350_v44 }
  0xaf   : > { %v353_v49 = vrot.slane %v352_v48, 1  ;;  %v333_v50 = vadd.f32 %v332_v47, %v331_v45 }
  0xb1   : > { %v354_v51 = vadd.f32 %v353_v49, %v352_v48 }
  0xb3   : > { %v356_v52 = vsel %vm355_vm2, %v333_v50, %v354_v51 }
  0xb4   : > { %357 = vst [vmem:[%s228_s28] sm:$0x3] %v356_v52 }
  0xb5 PF: > { %s14_s14 = sadd.s32 1, %s596_s14   ;;  %s665_s12 = smov %s592_s13 }
  0xb6   : > { %p11_p5 = scmp.ge.s32.totalorder %s14_s14, 4   ;;  %s666_s13 = smov %s668_s15 }
  0xb8   :  { %13 = sbr.rel (!%p11_p5) target bundleno = 2 (0x2), region = 70 }

// kernel: basic_block_arm_forward.11
= control target key start
LH: loop header
LB: loop body
LE: loop exit
PB: predicated region body
PF: predicated region fallthrough
CT: control target
= control target key end

     0   :  { %s745_s24 = smov 0   ;;  %s747_s25 = smov 0   ;;  %s873_s0 = inlined_call_operand.vmem [shape: bf16[2,64,128], index: 0, kind: input, shape index: {}]   ;;  %s874_s1 = inlined_call_operand.vmem [shape: f32[1,1,128], index: 1, kind: input, shape index: {}]   ;;  %s875_s2 = inlined_call_operand.vmem [shape: f32[1,1,128], index: 2, kind: input, shape index: {}]   ;;  %s876_s3 = inlined_call_operand.vmem [shape: f32[2,1,128], index: 3, kind: input, shape index: {}]   ;;  %s877_s4 = inlined_call_operand.vmem [shape: bf16[2,64,128], index: 4, kind: input, shape index: {}]   ;;  %s878_s5 = inlined_call_operand.vmem [shape: f32[1,1,128], index: 5, kind: input, shape index: {}]   ;;  %s879_s6 = inlined_call_operand.vmem [shape: f32[1,1,128], index: 6, kind: input, shape index: {}]   ;;  %s880_s7 = inlined_call_operand.vmem [shape: f32[2,64,128], index: 7, kind: output, shape index: {}]  }
   0x1   :  { %s749_s26 = smov 0  }
   0x2 LB: > { %s29_s27 = sadd.s32 1, %s699_s25  ;;  %p602_p0 = scmp.ge.s32.totalorder %s703_s26, 1  ;;  %s703_s26 = sphi %s749_s26, %s17_s26   ;;  %s699_s25 = sphi %s747_s25, %s882_s25   ;;  %s695_s24 = sphi %s745_s24, %s881_s24  }
   0x3   : > { %p31_p1 = scmp.ge.s32.totalorder %s29_s27, 2  ;;  %p283_p2 = scmp.lt.s32.totalorder %s703_s26, 3 }
   0x5   : > { %s884_s27 = smov (%p31_p1, %s29_s27), 0  ;;  %p284_p3 = pnand %p602_p0, %p283_p2 }
   0x6   : > { %p336_p4 = scmp.lt.s32.totalorder (!%p284_p3), %s695_s24, 1 }
   0x7   : > { %287 = sbr.rel (%p284_p3) target bundleno = 42 (0x2a), region = 48 }
   0xc   : > { %s886_s24 = smov (!%p336_p4, %s695_s24), 1  ;;  %v783_v0 = vld [vmem:[%s874_s1] ss:$0 sm:$0xff] }
   0xd   : > { %s611_s28 = sshll.u32 %s886_s24, 5  ;;  %s347_s8 = scalar_lea.vmem %s876_s3, %s886_s24  ;;  %v788_v1 = vld [vmem:[%s878_s5] ss:$0 sm:$0xff] }
   0xe   : > { %s773_s11 = scalar_lea.vmem %s873_s0, %s611_s28  ;;  %s778_s14 = scalar_lea.vmem %s877_s4, %s611_s28  ;;  %v796_v6 = vld [vmem:[%s875_s2] ss:$0 sm:$0xff] }
   0xf   : > { %v615_v2 = vld [vmem:[%s773_s11] sm:$0xff]   ;;  %v646_v4 = vld [vmem:[%s773_s11 + $0x8] sm:$0xff]   ;;  %v647_v25 = vld [vmem:[%s773_s11 + $0x10] sm:$0xff]   ;;  %s613_s23 = sshll.u32 %s886_s24, 6 }
  0x10   : > { %v631_v3 = vld [vmem:[%s778_s14] sm:$0xff]   ;;  %v616_v5 = vunpack.c.l.bf16 %v615_v2  ;;  %v617_v9 = vunpack.c.h.bf16 %v615_v2  ;;  %v649_v11 = vld [vmem:[%s778_s14 + $0x8] sm:$0xff]   ;;  %v620_v12 = vunpack.c.l.bf16 %v646_v4  ;;  %v621_v14 = vunpack.c.h.bf16 %v646_v4  ;;  %v650_v26 = vld [vmem:[%s778_s14 + $0x10] sm:$0xff]   ;;  %s834_s29 = scalar_lea.vmem %s880_s7, %s613_s23 }
  0x11   : > { %v632_v7 = vunpack.c.l.bf16 %v631_v3  ;;  %v801_v8 = vld [vmem:[%s879_s6] ss:$0 sm:$0xff]  ;;  %v633_v10 = vunpack.c.h.bf16 %v631_v3  ;;  %v636_v13 = vunpack.c.l.bf16 %v649_v11  ;;  %v637_v15 = vunpack.c.h.bf16 %v649_v11  ;;  %v648_v51 = vld [vmem:[%s773_s11 + $0x18] sm:$0xff]  }
  0x12   : > { %v388_v16 = vmul.f32 %v783_v0, %v616_v5  ;;  %v805_v17 = vld [vmem:[%s347_s8] ss:$0 sm:$0xff]  ;;  %v389_v19 = vmul.f32 %v783_v0, %v617_v9  ;;  %v390_v21 = vmul.f32 %v783_v0, %v620_v12  ;;  %v391_v23 = vmul.f32 %v783_v0, %v621_v14  ;;  %v651_v52 = vld [vmem:[%s778_s14 + $0x18] sm:$0xff]  }
  0x13   : > { %v440_v18 = vmul.f32 %v788_v1, %v632_v7  ;;  %v441_v20 = vmul.f32 %v788_v1, %v633_v10  ;;  %v442_v22 = vmul.f32 %v788_v1, %v636_v13  ;;  %v443_v24 = vmul.f32 %v788_v1, %v637_v15 }
  0x14   : > { %v400_v27 = vadd.f32 %v796_v6, %v388_v16  ;;  %v401_v29 = vadd.f32 %v796_v6, %v389_v19  ;;  %v402_v31 = vadd.f32 %v796_v6, %v390_v21  ;;  %v403_v33 = vadd.f32 %v796_v6, %v391_v23 }
  0x15   : > { %v452_v28 = vadd.f32 %v801_v8, %v440_v18  ;;  %v453_v30 = vadd.f32 %v801_v8, %v441_v20  ;;  %v454_v32 = vadd.f32 %v801_v8, %v442_v22  ;;  %v455_v34 = vadd.f32 %v801_v8, %v443_v24 }
  0x16   : > { %v412_v35 = vmul.f32 %v805_v17, %v400_v27  ;;  %v413_v36 = vmul.f32 %v805_v17, %v401_v29  ;;  %v624_v37 = vunpack.c.l.bf16 %v647_v25  ;;  %v640_v38 = vunpack.c.l.bf16 %v650_v26 }
  0x17   : > { %v414_v39 = vmul.f32 %v805_v17, %v402_v31  ;;  %v415_v40 = vmul.f32 %v805_v17, %v403_v33  ;;  %v625_v41 = vunpack.c.h.bf16 %v647_v25  ;;  %v641_v42 = vunpack.c.h.bf16 %v650_v26 }
  0x18   : > { %v460_v43 = vadd.f32 %v452_v28, %v412_v35  ;;  %v461_v44 = vadd.f32 %v453_v30, %v413_v36  ;;  %v392_v45 = vmul.f32 %v783_v0, %v624_v37  ;;  %v444_v46 = vmul.f32 %v788_v1, %v640_v38 }
  0x19   : > { %v462_v47 = vadd.f32 %v454_v32, %v414_v39  ;;  %v463_v48 = vadd.f32 %v455_v34, %v415_v40  ;;  %v393_v49 = vmul.f32 %v783_v0, %v625_v41  ;;  %v445_v50 = vmul.f32 %v788_v1, %v641_v42 }
  0x1a   : > { %v468_v53 = vmax.f32 %v460_v43, 0.0  ;;  %v469_v54 = vmax.f32 %v461_v44, 0.0  ;;  %v404_v55 = vadd.f32 %v796_v6, %v392_v45  ;;  %v456_v56 = vadd.f32 %v801_v8, %v444_v46 }
  0x1b   : > { %v470_v57 = vmax.f32 %v462_v47, 0.0  ;;  %v471_v58 = vmax.f32 %v463_v48, 0.0  ;;  %v405_v59 = vadd.f32 %v796_v6, %v393_v49  ;;  %v457_v60 = vadd.f32 %v801_v8, %v445_v50 }
  0x1c   : > { %476 = vst [vmem:[%s834_s29] sm:$0xff] %v468_v53  ;;  %v416_v61 = vmul.f32 %v805_v17, %v404_v55  ;;  %v628_v62 = vunpack.c.l.bf16 %v648_v51  ;;  %v644_v63 = vunpack.c.l.bf16 %v651_v52  ;;  %v629_v2 = vunpack.c.h.bf16 %v648_v51 }
  0x1d   : > { %477 = vst [vmem:[%s834_s29 + $0x8] sm:$0xff] %v469_v54  ;;  %v417_v3 = vmul.f32 %v805_v17, %v405_v59  ;;  %v645_v4 = vunpack.c.h.bf16 %v651_v52 }
  0x1e   : > { %478 = vst [vmem:[%s834_s29 + $0x10] sm:$0xff] %v470_v57  ;;  %v464_v5 = vadd.f32 %v456_v56, %v416_v61  ;;  %v394_v7 = vmul.f32 %v783_v0, %v628_v62  ;;  %v446_v9 = vmul.f32 %v788_v1, %v644_v63  ;;  %v395_v10 = vmul.f32 %v783_v0, %v629_v2 }
  0x1f   : > { %479 = vst [vmem:[%s834_s29 + $0x18] sm:$0xff] %v471_v58  ;;  %v465_v11 = vadd.f32 %v457_v60, %v417_v3  ;;  %v447_v12 = vmul.f32 %v788_v1, %v645_v4 }
  0x20   : > { %v472_v13 = vmax.f32 %v464_v5, 0.0  ;;  %v406_v14 = vadd.f32 %v796_v6, %v394_v7  ;;  %v458_v15 = vadd.f32 %v801_v8, %v446_v9  ;;  %v407_v16 = vadd.f32 %v796_v6, %v395_v10 }
  0x21   : > { %v473_v18 = vmax.f32 %v465_v11, 0.0  ;;  %v459_v19 = vadd.f32 %v801_v8, %v447_v12 }
  0x22   : > { %480 = vst [vmem:[%s834_s29 + $0x20] sm:$0xff] %v472_v13  ;;  %v418_v20 = vmul.f32 %v805_v17, %v406_v14  ;;  %v419_v0 = vmul.f32 %v805_v17, %v407_v16 }
  0x23   : > { %481 = vst [vmem:[%s834_s29 + $0x28] sm:$0xff] %v473_v18 }
  0x24   : > { %v466_v21 = vadd.f32 %v458_v15, %v418_v20  ;;  %v467_v22 = vadd.f32 %v459_v19, %v419_v0 }
  0x26   : > { %v474_v1 = vmax.f32 %v466_v21, 0.0  ;;  %v475_v23 = vmax.f32 %v467_v22, 0.0 }
  0x28   : > { %482 = vst [vmem:[%s834_s29 + $0x30] sm:$0xff] %v474_v1 }
  0x29   : > { %483 = vst [vmem:[%s834_s29 + $0x38] sm:$0xff] %v475_v23 }
  0x2a PF: > { %s17_s26 = sadd.s32 1, %s703_s26   ;;  %s881_s24 = smov %s699_s25 }
  0x2b   : > { %p14_p5 = scmp.ge.s32.totalorder %s17_s26, 4   ;;  %s882_s25 = smov %s884_s27 }
  0x2d   :  { %16 = sbr.rel (!%p14_p5) target bundleno = 2 (0x2), region = 84 }

</bundles_post_ra>
